<compile_context>
chip_gen: v6e
topology: v6e:2x2x1
jax: 0.10.0
libtpu: 0.0.40
codegen_flags: <defaults>
</compile_context>

<pallas_src>
import functools

import jax
import jax.numpy as jnp
from jax.experimental import pallas as pl
from jax.experimental.pallas import tpu as pltpu


def make_lstm_kernel(num_layers, seq_len, batch, hidden_dim):
    H, T, B, L = hidden_dim, seq_len, batch, num_layers

    def kernel(*args):
        # args: x_ref, [w_ih_T, w_hh_T, b] * L, out_ref, zin_scr
        x_ref = args[0]                         # (T*B, D) time-major, f32
        layer_refs = args[1:1 + 3 * L]
        out_ref = args[1 + 3 * L]               # (B, H): h_{T-1} of last layer
        zin_scr = args[2 + 3 * L]               # (T*B, 4H) f32 scratch

        f32 = jnp.float32
        bf16 = jnp.bfloat16

        # ---- one-time hoists (bf16 MXU operands; tiny at H=32) -------------
        w_hh = [layer_refs[3 * l + 1][...].astype(bf16) for l in range(L)]
        w_ih = [None] + [layer_refs[3 * l][...].astype(bf16)
                         for l in range(1, L)]
        bias = [None] + [jnp.broadcast_to(layer_refs[3 * l + 2][...],
                                          (B, 4 * H))
                         for l in range(1, L)]

        # ---- layer-0 input projection + bias, hoisted off the recurrence ---
        zin_scr[...] = (
            jnp.dot(x_ref[...].astype(bf16), layer_refs[0][...].astype(bf16),
                    preferred_element_type=f32)
            + layer_refs[2][...])

        # h0 = c0 = 0 (matches the PyTorch forward); carried in registers.
        h_bf = [jnp.zeros((B, H), bf16) for _ in range(L)]   # MXU-operand copy
        c = [jnp.zeros((B, H), f32) for _ in range(L)]
        last_h = jnp.zeros((B, H), f32)

        def lstm_step(z, c_prev):
            # Two full-vreg EUP passes; gates pulled to lanes 0:H via XLU rolls
            # (the per-lane i|f|g|o blocks otherwise need relayout copies on
            # the recurrence chain).
            sig = jax.nn.sigmoid(z)            # i | f | . | o lanes
            th = jnp.tanh(z)                   # . | . | g | . lanes
            i_g = sig[:, :H]
            f_g = pltpu.roll(sig, shift=3 * H, axis=1)[:, :H]
            g_g = pltpu.roll(th, shift=2 * H, axis=1)[:, :H]
            o_g = pltpu.roll(sig, shift=H, axis=1)[:, :H]
            c_new = f_g * c_prev + i_g * g_g
            h_new = o_g * jnp.tanh(c_new)
            return h_new, c_new

        # ---- wavefront over (layer, time): step (l,t) needs (l,t-1),(l-1,t) -
        # Within a wave, walk layers high -> low so h_bf[l-1] still holds the
        # value for timestep t (layer l-1 updates it later in the same wave).
        for w in range(T + L - 1):
            for l in range(L - 1, -1, -1):
                t = w - l
                if not (0 <= t < T):
                    continue
                rec = jnp.dot(h_bf[l], w_hh[l], preferred_element_type=f32)
                if l == 0:
                    z = zin_scr[pl.ds(t * B, B), :] + rec
                else:
                    z = (jnp.dot(h_bf[l - 1], w_ih[l],
                                 preferred_element_type=f32)
                         + rec + bias[l])
                h_new, c_new = lstm_step(z, c[l])
                c[l] = c_new
                h_bf[l] = h_new.astype(bf16)
                if l == L - 1:
                    last_h = h_new

        out_ref[...] = last_h

    return kernel


def lstm_forward_pallas(x, params, *, num_layers, hidden_dim, output_dim):
    """x: (B, T, D) float32 (batch_first, as in PyTorch). Returns (B, output_dim)."""
    B, T, D = x.shape
    # Time-major, flattened to (T*B, D): layer-0 input projection becomes one
    # large GEMM and each timestep is a sublane-aligned row block.
    x_flat = jnp.transpose(x, (1, 0, 2)).reshape(T * B, D)

    kernel = make_lstm_kernel(num_layers, T, B, hidden_dim)

    inputs = [x_flat]
    for l in range(num_layers):
        w_ih_T, w_hh_T, b = params["layers"][l]
        inputs += [w_ih_T, w_hh_T, b]

    vmem = pl.BlockSpec(memory_space=pltpu.MemorySpace.VMEM)

    h_last = pl.pallas_call(
        kernel,
        out_shape=jax.ShapeDtypeStruct((B, hidden_dim), jnp.float32),
        in_specs=[vmem] * len(inputs),
        out_specs=vmem,
        scratch_shapes=[
            pltpu.VMEM((T * B, 4 * hidden_dim), jnp.float32),  # layer-0 Z_in
        ],
        # VMEM budget guard (matters first on v7x's 64 MiB); resident data
        # here is < 1 MiB, so 16 MiB is generous headroom on every generation.
        compiler_params=pltpu.CompilerParams(
            vmem_limit_bytes=16 * 1024 * 1024),
    )(*inputs)

    # fc(out[:, -1, :]) left to XLA: with output_dim=1 an in-kernel MXU dot
    # would produce a 1-lane result and a masked vst.msk epilogue store.
    return (jnp.dot(h_last, params["fc_w_T"],
                    precision=jax.lax.Precision.HIGHEST)
            + params["fc_b"])


def init_params(key, input_dim, hidden_dim, num_layers, output_dim):
    """Deterministic synthetic parameters (PyTorch-like uniform init)."""
    H = hidden_dim
    scale = 1.0 / jnp.sqrt(jnp.float32(H))
    keys = jax.random.split(key, 4 * num_layers + 2)
    layers = []
    for l in range(num_layers):
        d_in = input_dim if l == 0 else H
        k0, k1, k2, k3 = keys[4 * l:4 * l + 4]
        w_ih = jax.random.uniform(k0, (4 * H, d_in), jnp.float32, -scale, scale)
        w_hh = jax.random.uniform(k1, (4 * H, H), jnp.float32, -scale, scale)
        b_ih = jax.random.uniform(k2, (4 * H,), jnp.float32, -scale, scale)
        b_hh = jax.random.uniform(k3, (4 * H,), jnp.float32, -scale, scale)
        layers.append((w_ih.T, w_hh.T, (b_ih + b_hh).reshape(1, 4 * H)))
    kfw, kfb = keys[-2], keys[-1]
    fc_w = jax.random.uniform(kfw, (output_dim, H), jnp.float32, -scale, scale)
    fc_b = jax.random.uniform(kfb, (output_dim,), jnp.float32, -scale, scale)
    return {"layers": layers, "fc_w_T": fc_w.T, "fc_b": fc_b.reshape(1, output_dim)}


def lstm_forward_ref(x, params, *, num_layers, hidden_dim, output_dim):
    """Pure-JAX reference (f32, highest matmul precision) for verification."""
    B, T, D = x.shape
    H = hidden_dim
    hp = jax.lax.Precision.HIGHEST
    seq = x
    for l in range(num_layers):
        w_ih_T, w_hh_T, b = params["layers"][l]
        h = jnp.zeros((B, H), jnp.float32)
        c = jnp.zeros((B, H), jnp.float32)
        outs = []
        for t in range(T):
            z = (jnp.dot(seq[:, t, :], w_ih_T, precision=hp)
                 + jnp.dot(h, w_hh_T, precision=hp) + b)
            i_g = jax.nn.sigmoid(z[:, 0:H])
            f_g = jax.nn.sigmoid(z[:, H:2 * H])
            g_g = jnp.tanh(z[:, 2 * H:3 * H])
            o_g = jax.nn.sigmoid(z[:, 3 * H:4 * H])
            c = f_g * c + i_g * g_g
            h = o_g * jnp.tanh(c)
            outs.append(h)
        seq = jnp.stack(outs, axis=1)
    return jnp.dot(seq[:, -1, :], params["fc_w_T"], precision=hp) + params["fc_b"]


if __name__ == "__main__":
    # Small, LSTM-consistent shapes.
    B, T = 8, 8              # batch, sequence length
    input_dim = 16
    hidden_dim = 32
    num_layers = 2
    output_dim = 1

    key = jax.random.PRNGKey(0)
    kx, kp = jax.random.split(key)
    x = jax.random.normal(kx, (B, T, input_dim), jnp.float32)
    params = init_params(kp, input_dim, hidden_dim, num_layers, output_dim)

    fwd = functools.partial(lstm_forward_pallas, num_layers=num_layers,
                            hidden_dim=hidden_dim, output_dim=output_dim)
    out = jax.jit(fwd)(x, params)
    out = jax.block_until_ready(out)

    ref = lstm_forward_ref(x, params, num_layers=num_layers,
                           hidden_dim=hidden_dim, output_dim=output_dim)
    assert out.shape == (B, output_dim)
    # bf16 MXU operands (f32 accumulation) in the kernel -> looser tolerance
    # than the pure-f32 reference; structural bugs would show up as O(0.1+).
    assert jnp.allclose(out, ref, atol=3e-2, rtol=3e-2), "mismatch vs reference"

    print("KERNEL_OK")
</pallas_src>

<mosaic_0001>
module attributes {stable_mosaic.version = 11 : i64} {
  func.func @kernel(%arg0: memref<64x16xf32, #tpu.memory_space<vmem>>, %arg1: memref<16x128xf32, #tpu.memory_space<vmem>>, %arg2: memref<32x128xf32, #tpu.memory_space<vmem>>, %arg3: memref<1x128xf32, #tpu.memory_space<vmem>>, %arg4: memref<32x128xf32, #tpu.memory_space<vmem>>, %arg5: memref<32x128xf32, #tpu.memory_space<vmem>>, %arg6: memref<1x128xf32, #tpu.memory_space<vmem>>, %arg7: memref<8x32xf32, #tpu.memory_space<vmem>>, %arg8: memref<64x128xf32, #tpu.memory_space<vmem>>) attributes {dimension_semantics = [], scalar_prefetch = 0 : i64, scratch_operands = 1 : i64, tpu.core_type = #tpu.core_type<tc>} {
    %c0 = arith.constant 0 : index
    %c0_0 = arith.constant 0 : index
    %0 = vector.load %arg2[%c0, %c0_0] : memref<32x128xf32, #tpu.memory_space<vmem>>, vector<32x128xf32>
    %1 = arith.truncf %0 : vector<32x128xf32> to vector<32x128xbf16>
    %c0_1 = arith.constant 0 : index
    %c0_2 = arith.constant 0 : index
    %2 = vector.load %arg5[%c0_1, %c0_2] : memref<32x128xf32, #tpu.memory_space<vmem>>, vector<32x128xf32>
    %3 = arith.truncf %2 : vector<32x128xf32> to vector<32x128xbf16>
    %c0_3 = arith.constant 0 : index
    %c0_4 = arith.constant 0 : index
    %4 = vector.load %arg4[%c0_3, %c0_4] : memref<32x128xf32, #tpu.memory_space<vmem>>, vector<32x128xf32>
    %5 = arith.truncf %4 : vector<32x128xf32> to vector<32x128xbf16>
    %c0_5 = arith.constant 0 : index
    %c0_6 = arith.constant 0 : index
    %6 = vector.load %arg6[%c0_5, %c0_6] : memref<1x128xf32, #tpu.memory_space<vmem>>, vector<1x128xf32>
    %7 = vector.shape_cast %6 : vector<1x128xf32> to vector<1x128xf32>
    %8 = vector.broadcast %7 : vector<1x128xf32> to vector<8x128xf32>
    %c0_7 = arith.constant 0 : index
    %c0_8 = arith.constant 0 : index
    %9 = vector.load %arg0[%c0_7, %c0_8] : memref<64x16xf32, #tpu.memory_space<vmem>>, vector<64x16xf32>
    %10 = arith.truncf %9 : vector<64x16xf32> to vector<64x16xbf16>
    %c0_9 = arith.constant 0 : index
    %c0_10 = arith.constant 0 : index
    %11 = vector.load %arg1[%c0_9, %c0_10] : memref<16x128xf32, #tpu.memory_space<vmem>>, vector<16x128xf32>
    %12 = arith.truncf %11 : vector<16x128xf32> to vector<16x128xbf16>
    %cst = arith.constant dense<0.000000e+00> : vector<64x128xf32>
    %13 = tpu.matmul %10, %12, %cst {dimension_numbers = #tpu.dot_dimension_numbers<[1], [0], [0], [1], [0, 0, 1, 1], [], []>} : vector<64x16xbf16>, vector<16x128xbf16>, vector<64x128xf32> -> vector<64x128xf32>
    %c0_11 = arith.constant 0 : index
    %c0_12 = arith.constant 0 : index
    %14 = vector.load %arg3[%c0_11, %c0_12] : memref<1x128xf32, #tpu.memory_space<vmem>>, vector<1x128xf32>
    %15 = vector.broadcast %14 : vector<1x128xf32> to vector<64x128xf32>
    %16 = arith.addf %13, %15 : vector<64x128xf32>
    %c0_13 = arith.constant 0 : index
    %c0_14 = arith.constant 0 : index
    %17 = vector.load %arg8[%c0_13, %c0_14] : memref<64x128xf32, #tpu.memory_space<vmem>>, vector<64x128xf32>
    tpu.vector_store %arg8[%c0_13, %c0_14], %16 {strides = array<i32>} : memref<64x128xf32, #tpu.memory_space<vmem>>, vector<64x128xf32>,
    %cst_15 = arith.constant 0.000000e+00 : bf16
    %18 = vector.broadcast %cst_15 : bf16 to vector<8x32xbf16>
    %cst_16 = arith.constant 0.000000e+00 : bf16
    %19 = vector.broadcast %cst_16 : bf16 to vector<8x32xbf16>
    %cst_17 = arith.constant 0.000000e+00 : f32
    %20 = vector.broadcast %cst_17 : f32 to vector<8x32xf32>
    %cst_18 = arith.constant 0.000000e+00 : f32
    %21 = vector.broadcast %cst_18 : f32 to vector<8x32xf32>
    %cst_19 = arith.constant dense<0.000000e+00> : vector<8x128xf32>
    %22 = tpu.matmul %18, %1, %cst_19 {dimension_numbers = #tpu.dot_dimension_numbers<[1], [0], [0], [1], [0, 0, 1, 1], [], []>} : vector<8x32xbf16>, vector<32x128xbf16>, vector<8x128xf32> -> vector<8x128xf32>
    %c0_20 = arith.constant 0 : index
    %c0_21 = arith.constant 0 : index
    %23 = vector.load %arg8[%c0_20, %c0_21] : memref<64x128xf32, #tpu.memory_space<vmem>>, vector<8x128xf32>
    %24 = arith.addf %23, %22 : vector<8x128xf32>
    %25 = arith.negf %24 : vector<8x128xf32>
    %26 = math.exp %25 : vector<8x128xf32>
    %cst_22 = arith.constant 1.000000e+00 : f32
    %27 = vector.broadcast %cst_22 : f32 to vector<8x128xf32>
    %28 = arith.addf %27, %26 : vector<8x128xf32>
    %29 = arith.divf %27, %28 : vector<8x128xf32>
    %30 = math.tanh %24 : vector<8x128xf32>
    %31 = vector.extract_strided_slice %29 {offsets = [0, 0], sizes = [8, 32], strides = [1, 1]} : vector<8x128xf32> to vector<8x32xf32>
    %c96_i32 = arith.constant 96 : i32
    %32 = tpu.dynamic_rotate %29 by %c96_i32 dim 1 : vector<8x128xf32>, i32 -> vector<8x128xf32>
    %33 = vector.extract_strided_slice %32 {offsets = [0, 0], sizes = [8, 32], strides = [1, 1]} : vector<8x128xf32> to vector<8x32xf32>
    %c64_i32 = arith.constant 64 : i32
    %34 = tpu.dynamic_rotate %30 by %c64_i32 dim 1 : vector<8x128xf32>, i32 -> vector<8x128xf32>
    %35 = vector.extract_strided_slice %34 {offsets = [0, 0], sizes = [8, 32], strides = [1, 1]} : vector<8x128xf32> to vector<8x32xf32>
    %c32_i32 = arith.constant 32 : i32
    %36 = tpu.dynamic_rotate %29 by %c32_i32 dim 1 : vector<8x128xf32>, i32 -> vector<8x128xf32>
    %37 = vector.extract_strided_slice %36 {offsets = [0, 0], sizes = [8, 32], strides = [1, 1]} : vector<8x128xf32> to vector<8x32xf32>
    %38 = arith.mulf %33, %20 : vector<8x32xf32>
    %39 = arith.mulf %31, %35 : vector<8x32xf32>
    %40 = arith.addf %38, %39 : vector<8x32xf32>
    %41 = math.tanh %40 : vector<8x32xf32>
    %42 = arith.mulf %37, %41 : vector<8x32xf32>
    %43 = arith.truncf %42 : vector<8x32xf32> to vector<8x32xbf16>
    %cst_23 = arith.constant dense<0.000000e+00> : vector<8x128xf32>
    %44 = tpu.matmul %19, %3, %cst_23 {dimension_numbers = #tpu.dot_dimension_numbers<[1], [0], [0], [1], [0, 0, 1, 1], [], []>} : vector<8x32xbf16>, vector<32x128xbf16>, vector<8x128xf32> -> vector<8x128xf32>
    %cst_24 = arith.constant dense<0.000000e+00> : vector<8x128xf32>
    %45 = tpu.matmul %43, %5, %cst_24 {dimension_numbers = #tpu.dot_dimension_numbers<[1], [0], [0], [1], [0, 0, 1, 1], [], []>} : vector<8x32xbf16>, vector<32x128xbf16>, vector<8x128xf32> -> vector<8x128xf32>
    %46 = arith.addf %45, %44 : vector<8x128xf32>
    %47 = arith.addf %46, %8 : vector<8x128xf32>
    %48 = arith.negf %47 : vector<8x128xf32>
    %49 = math.exp %48 : vector<8x128xf32>
    %cst_25 = arith.constant 1.000000e+00 : f32
    %50 = vector.broadcast %cst_25 : f32 to vector<8x128xf32>
    %51 = arith.addf %50, %49 : vector<8x128xf32>
    %52 = arith.divf %50, %51 : vector<8x128xf32>
    %53 = math.tanh %47 : vector<8x128xf32>
    %54 = vector.extract_strided_slice %52 {offsets = [0, 0], sizes = [8, 32], strides = [1, 1]} : vector<8x128xf32> to vector<8x32xf32>
    %c96_i32_26 = arith.constant 96 : i32
    %55 = tpu.dynamic_rotate %52 by %c96_i32_26 dim 1 : vector<8x128xf32>, i32 -> vector<8x128xf32>
    %56 = vector.extract_strided_slice %55 {offsets = [0, 0], sizes = [8, 32], strides = [1, 1]} : vector<8x128xf32> to vector<8x32xf32>
    %c64_i32_27 = arith.constant 64 : i32
    %57 = tpu.dynamic_rotate %53 by %c64_i32_27 dim 1 : vector<8x128xf32>, i32 -> vector<8x128xf32>
    %58 = vector.extract_strided_slice %57 {offsets = [0, 0], sizes = [8, 32], strides = [1, 1]} : vector<8x128xf32> to vector<8x32xf32>
    %c32_i32_28 = arith.constant 32 : i32
    %59 = tpu.dynamic_rotate %52 by %c32_i32_28 dim 1 : vector<8x128xf32>, i32 -> vector<8x128xf32>
    %60 = vector.extract_strided_slice %59 {offsets = [0, 0], sizes = [8, 32], strides = [1, 1]} : vector<8x128xf32> to vector<8x32xf32>
    %61 = arith.mulf %56, %21 : vector<8x32xf32>
    %62 = arith.mulf %54, %58 : vector<8x32xf32>
    %63 = arith.addf %61, %62 : vector<8x32xf32>
    %64 = math.tanh %63 : vector<8x32xf32>
    %65 = arith.mulf %60, %64 : vector<8x32xf32>
    %66 = arith.truncf %65 : vector<8x32xf32> to vector<8x32xbf16>
    %cst_29 = arith.constant dense<0.000000e+00> : vector<8x128xf32>
    %67 = tpu.matmul %43, %1, %cst_29 {dimension_numbers = #tpu.dot_dimension_numbers<[1], [0], [0], [1], [0, 0, 1, 1], [], []>} : vector<8x32xbf16>, vector<32x128xbf16>, vector<8x128xf32> -> vector<8x128xf32>
    %c8 = arith.constant 8 : index
    %c0_30 = arith.constant 0 : index
    %68 = vector.load %arg8[%c8, %c0_30] : memref<64x128xf32, #tpu.memory_space<vmem>>, vector<8x128xf32>
    %69 = arith.addf %68, %67 : vector<8x128xf32>
    %70 = arith.negf %69 : vector<8x128xf32>
    %71 = math.exp %70 : vector<8x128xf32>
    %cst_31 = arith.constant 1.000000e+00 : f32
    %72 = vector.broadcast %cst_31 : f32 to vector<8x128xf32>
    %73 = arith.addf %72, %71 : vector<8x128xf32>
    %74 = arith.divf %72, %73 : vector<8x128xf32>
    %75 = math.tanh %69 : vector<8x128xf32>
    %76 = vector.extract_strided_slice %74 {offsets = [0, 0], sizes = [8, 32], strides = [1, 1]} : vector<8x128xf32> to vector<8x32xf32>
    %c96_i32_32 = arith.constant 96 : i32
    %77 = tpu.dynamic_rotate %74 by %c96_i32_32 dim 1 : vector<8x128xf32>, i32 -> vector<8x128xf32>
    %78 = vector.extract_strided_slice %77 {offsets = [0, 0], sizes = [8, 32], strides = [1, 1]} : vector<8x128xf32> to vector<8x32xf32>
    %c64_i32_33 = arith.constant 64 : i32
    %79 = tpu.dynamic_rotate %75 by %c64_i32_33 dim 1 : vector<8x128xf32>, i32 -> vector<8x128xf32>
    %80 = vector.extract_strided_slice %79 {offsets = [0, 0], sizes = [8, 32], strides = [1, 1]} : vector<8x128xf32> to vector<8x32xf32>
    %c32_i32_34 = arith.constant 32 : i32
    %81 = tpu.dynamic_rotate %74 by %c32_i32_34 dim 1 : vector<8x128xf32>, i32 -> vector<8x128xf32>
    %82 = vector.extract_strided_slice %81 {offsets = [0, 0], sizes = [8, 32], strides = [1, 1]} : vector<8x128xf32> to vector<8x32xf32>
    %83 = arith.mulf %78, %40 : vector<8x32xf32>
    %84 = arith.mulf %76, %80 : vector<8x32xf32>
    %85 = arith.addf %83, %84 : vector<8x32xf32>
    %86 = math.tanh %85 : vector<8x32xf32>
    %87 = arith.mulf %82, %86 : vector<8x32xf32>
    %88 = arith.truncf %87 : vector<8x32xf32> to vector<8x32xbf16>
    %cst_35 = arith.constant dense<0.000000e+00> : vector<8x128xf32>
    %89 = tpu.matmul %66, %3, %cst_35 {dimension_numbers = #tpu.dot_dimension_numbers<[1], [0], [0], [1], [0, 0, 1, 1], [], []>} : vector<8x32xbf16>, vector<32x128xbf16>, vector<8x128xf32> -> vector<8x128xf32>
    %cst_36 = arith.constant dense<0.000000e+00> : vector<8x128xf32>
    %90 = tpu.matmul %88, %5, %cst_36 {dimension_numbers = #tpu.dot_dimension_numbers<[1], [0], [0], [1], [0, 0, 1, 1], [], []>} : vector<8x32xbf16>, vector<32x128xbf16>, vector<8x128xf32> -> vector<8x128xf32>
    %91 = arith.addf %90, %89 : vector<8x128xf32>
    %92 = arith.addf %91, %8 : vector<8x128xf32>
    %93 = arith.negf %92 : vector<8x128xf32>
    %94 = math.exp %93 : vector<8x128xf32>
    %cst_37 = arith.constant 1.000000e+00 : f32
    %95 = vector.broadcast %cst_37 : f32 to vector<8x128xf32>
    %96 = arith.addf %95, %94 : vector<8x128xf32>
    %97 = arith.divf %95, %96 : vector<8x128xf32>
    %98 = math.tanh %92 : vector<8x128xf32>
    %99 = vector.extract_strided_slice %97 {offsets = [0, 0], sizes = [8, 32], strides = [1, 1]} : vector<8x128xf32> to vector<8x32xf32>
    %c96_i32_38 = arith.constant 96 : i32
    %100 = tpu.dynamic_rotate %97 by %c96_i32_38 dim 1 : vector<8x128xf32>, i32 -> vector<8x128xf32>
    %101 = vector.extract_strided_slice %100 {offsets = [0, 0], sizes = [8, 32], strides = [1, 1]} : vector<8x128xf32> to vector<8x32xf32>
    %c64_i32_39 = arith.constant 64 : i32
    %102 = tpu.dynamic_rotate %98 by %c64_i32_39 dim 1 : vector<8x128xf32>, i32 -> vector<8x128xf32>
    %103 = vector.extract_strided_slice %102 {offsets = [0, 0], sizes = [8, 32], strides = [1, 1]} : vector<8x128xf32> to vector<8x32xf32>
    %c32_i32_40 = arith.constant 32 : i32
    %104 = tpu.dynamic_rotate %97 by %c32_i32_40 dim 1 : vector<8x128xf32>, i32 -> vector<8x128xf32>
    %105 = vector.extract_strided_slice %104 {offsets = [0, 0], sizes = [8, 32], strides = [1, 1]} : vector<8x128xf32> to vector<8x32xf32>
    %106 = arith.mulf %101, %63 : vector<8x32xf32>
    %107 = arith.mulf %99, %103 : vector<8x32xf32>
    %108 = arith.addf %106, %107 : vector<8x32xf32>
    %109 = math.tanh %108 : vector<8x32xf32>
    %110 = arith.mulf %105, %109 : vector<8x32xf32>
    %111 = arith.truncf %110 : vector<8x32xf32> to vector<8x32xbf16>
    %cst_41 = arith.constant dense<0.000000e+00> : vector<8x128xf32>
    %112 = tpu.matmul %88, %1, %cst_41 {dimension_numbers = #tpu.dot_dimension_numbers<[1], [0], [0], [1], [0, 0, 1, 1], [], []>} : vector<8x32xbf16>, vector<32x128xbf16>, vector<8x128xf32> -> vector<8x128xf32>
    %c16 = arith.constant 16 : index
    %c0_42 = arith.constant 0 : index
    %113 = vector.load %arg8[%c16, %c0_42] : memref<64x128xf32, #tpu.memory_space<vmem>>, vector<8x128xf32>
    %114 = arith.addf %113, %112 : vector<8x128xf32>
    %115 = arith.negf %114 : vector<8x128xf32>
    %116 = math.exp %115 : vector<8x128xf32>
    %cst_43 = arith.constant 1.000000e+00 : f32
    %117 = vector.broadcast %cst_43 : f32 to vector<8x128xf32>
    %118 = arith.addf %117, %116 : vector<8x128xf32>
    %119 = arith.divf %117, %118 : vector<8x128xf32>
    %120 = math.tanh %114 : vector<8x128xf32>
    %121 = vector.extract_strided_slice %119 {offsets = [0, 0], sizes = [8, 32], strides = [1, 1]} : vector<8x128xf32> to vector<8x32xf32>
    %c96_i32_44 = arith.constant 96 : i32
    %122 = tpu.dynamic_rotate %119 by %c96_i32_44 dim 1 : vector<8x128xf32>, i32 -> vector<8x128xf32>
    %123 = vector.extract_strided_slice %122 {offsets = [0, 0], sizes = [8, 32], strides = [1, 1]} : vector<8x128xf32> to vector<8x32xf32>
    %c64_i32_45 = arith.constant 64 : i32
    %124 = tpu.dynamic_rotate %120 by %c64_i32_45 dim 1 : vector<8x128xf32>, i32 -> vector<8x128xf32>
    %125 = vector.extract_strided_slice %124 {offsets = [0, 0], sizes = [8, 32], strides = [1, 1]} : vector<8x128xf32> to vector<8x32xf32>
    %c32_i32_46 = arith.constant 32 : i32
    %126 = tpu.dynamic_rotate %119 by %c32_i32_46 dim 1 : vector<8x128xf32>, i32 -> vector<8x128xf32>
    %127 = vector.extract_strided_slice %126 {offsets = [0, 0], sizes = [8, 32], strides = [1, 1]} : vector<8x128xf32> to vector<8x32xf32>
    %128 = arith.mulf %123, %85 : vector<8x32xf32>
    %129 = arith.mulf %121, %125 : vector<8x32xf32>
    %130 = arith.addf %128, %129 : vector<8x32xf32>
    %131 = math.tanh %130 : vector<8x32xf32>
    %132 = arith.mulf %127, %131 : vector<8x32xf32>
    %133 = arith.truncf %132 : vector<8x32xf32> to vector<8x32xbf16>
    %cst_47 = arith.constant dense<0.000000e+00> : vector<8x128xf32>
    %134 = tpu.matmul %111, %3, %cst_47 {dimension_numbers = #tpu.dot_dimension_numbers<[1], [0], [0], [1], [0, 0, 1, 1], [], []>} : vector<8x32xbf16>, vector<32x128xbf16>, vector<8x128xf32> -> vector<8x128xf32>
    %cst_48 = arith.constant dense<0.000000e+00> : vector<8x128xf32>
    %135 = tpu.matmul %133, %5, %cst_48 {dimension_numbers = #tpu.dot_dimension_numbers<[1], [0], [0], [1], [0, 0, 1, 1], [], []>} : vector<8x32xbf16>, vector<32x128xbf16>, vector<8x128xf32> -> vector<8x128xf32>
    %136 = arith.addf %135, %134 : vector<8x128xf32>
    %137 = arith.addf %136, %8 : vector<8x128xf32>
    %138 = arith.negf %137 : vector<8x128xf32>
    %139 = math.exp %138 : vector<8x128xf32>
    %cst_49 = arith.constant 1.000000e+00 : f32
    %140 = vector.broadcast %cst_49 : f32 to vector<8x128xf32>
    %141 = arith.addf %140, %139 : vector<8x128xf32>
    %142 = arith.divf %140, %141 : vector<8x128xf32>
    %143 = math.tanh %137 : vector<8x128xf32>
    %144 = vector.extract_strided_slice %142 {offsets = [0, 0], sizes = [8, 32], strides = [1, 1]} : vector<8x128xf32> to vector<8x32xf32>
    %c96_i32_50 = arith.constant 96 : i32
    %145 = tpu.dynamic_rotate %142 by %c96_i32_50 dim 1 : vector<8x128xf32>, i32 -> vector<8x128xf32>
    %146 = vector.extract_strided_slice %145 {offsets = [0, 0], sizes = [8, 32], strides = [1, 1]} : vector<8x128xf32> to vector<8x32xf32>
    %c64_i32_51 = arith.constant 64 : i32
    %147 = tpu.dynamic_rotate %143 by %c64_i32_51 dim 1 : vector<8x128xf32>, i32 -> vector<8x128xf32>
    %148 = vector.extract_strided_slice %147 {offsets = [0, 0], sizes = [8, 32], strides = [1, 1]} : vector<8x128xf32> to vector<8x32xf32>
    %c32_i32_52 = arith.constant 32 : i32
    %149 = tpu.dynamic_rotate %142 by %c32_i32_52 dim 1 : vector<8x128xf32>, i32 -> vector<8x128xf32>
    %150 = vector.extract_strided_slice %149 {offsets = [0, 0], sizes = [8, 32], strides = [1, 1]} : vector<8x128xf32> to vector<8x32xf32>
    %151 = arith.mulf %146, %108 : vector<8x32xf32>
    %152 = arith.mulf %144, %148 : vector<8x32xf32>
    %153 = arith.addf %151, %152 : vector<8x32xf32>
    %154 = math.tanh %153 : vector<8x32xf32>
    %155 = arith.mulf %150, %154 : vector<8x32xf32>
    %156 = arith.truncf %155 : vector<8x32xf32> to vector<8x32xbf16>
    %cst_53 = arith.constant dense<0.000000e+00> : vector<8x128xf32>
    %157 = tpu.matmul %133, %1, %cst_53 {dimension_numbers = #tpu.dot_dimension_numbers<[1], [0], [0], [1], [0, 0, 1, 1], [], []>} : vector<8x32xbf16>, vector<32x128xbf16>, vector<8x128xf32> -> vector<8x128xf32>
    %c24 = arith.constant 24 : index
    %c0_54 = arith.constant 0 : index
    %158 = vector.load %arg8[%c24, %c0_54] : memref<64x128xf32, #tpu.memory_space<vmem>>, vector<8x128xf32>
    %159 = arith.addf %158, %157 : vector<8x128xf32>
    %160 = arith.negf %159 : vector<8x128xf32>
    %161 = math.exp %160 : vector<8x128xf32>
    %cst_55 = arith.constant 1.000000e+00 : f32
    %162 = vector.broadcast %cst_55 : f32 to vector<8x128xf32>
    %163 = arith.addf %162, %161 : vector<8x128xf32>
    %164 = arith.divf %162, %163 : vector<8x128xf32>
    %165 = math.tanh %159 : vector<8x128xf32>
    %166 = vector.extract_strided_slice %164 {offsets = [0, 0], sizes = [8, 32], strides = [1, 1]} : vector<8x128xf32> to vector<8x32xf32>
    %c96_i32_56 = arith.constant 96 : i32
    %167 = tpu.dynamic_rotate %164 by %c96_i32_56 dim 1 : vector<8x128xf32>, i32 -> vector<8x128xf32>
    %168 = vector.extract_strided_slice %167 {offsets = [0, 0], sizes = [8, 32], strides = [1, 1]} : vector<8x128xf32> to vector<8x32xf32>
    %c64_i32_57 = arith.constant 64 : i32
    %169 = tpu.dynamic_rotate %165 by %c64_i32_57 dim 1 : vector<8x128xf32>, i32 -> vector<8x128xf32>
    %170 = vector.extract_strided_slice %169 {offsets = [0, 0], sizes = [8, 32], strides = [1, 1]} : vector<8x128xf32> to vector<8x32xf32>
    %c32_i32_58 = arith.constant 32 : i32
    %171 = tpu.dynamic_rotate %164 by %c32_i32_58 dim 1 : vector<8x128xf32>, i32 -> vector<8x128xf32>
    %172 = vector.extract_strided_slice %171 {offsets = [0, 0], sizes = [8, 32], strides = [1, 1]} : vector<8x128xf32> to vector<8x32xf32>
    %173 = arith.mulf %168, %130 : vector<8x32xf32>
    %174 = arith.mulf %166, %170 : vector<8x32xf32>
    %175 = arith.addf %173, %174 : vector<8x32xf32>
    %176 = math.tanh %175 : vector<8x32xf32>
    %177 = arith.mulf %172, %176 : vector<8x32xf32>
    %178 = arith.truncf %177 : vector<8x32xf32> to vector<8x32xbf16>
    %cst_59 = arith.constant dense<0.000000e+00> : vector<8x128xf32>
    %179 = tpu.matmul %156, %3, %cst_59 {dimension_numbers = #tpu.dot_dimension_numbers<[1], [0], [0], [1], [0, 0, 1, 1], [], []>} : vector<8x32xbf16>, vector<32x128xbf16>, vector<8x128xf32> -> vector<8x128xf32>
    %cst_60 = arith.constant dense<0.000000e+00> : vector<8x128xf32>
    %180 = tpu.matmul %178, %5, %cst_60 {dimension_numbers = #tpu.dot_dimension_numbers<[1], [0], [0], [1], [0, 0, 1, 1], [], []>} : vector<8x32xbf16>, vector<32x128xbf16>, vector<8x128xf32> -> vector<8x128xf32>
    %181 = arith.addf %180, %179 : vector<8x128xf32>
    %182 = arith.addf %181, %8 : vector<8x128xf32>
    %183 = arith.negf %182 : vector<8x128xf32>
    %184 = math.exp %183 : vector<8x128xf32>
    %cst_61 = arith.constant 1.000000e+00 : f32
    %185 = vector.broadcast %cst_61 : f32 to vector<8x128xf32>
    %186 = arith.addf %185, %184 : vector<8x128xf32>
    %187 = arith.divf %185, %186 : vector<8x128xf32>
    %188 = math.tanh %182 : vector<8x128xf32>
    %189 = vector.extract_strided_slice %187 {offsets = [0, 0], sizes = [8, 32], strides = [1, 1]} : vector<8x128xf32> to vector<8x32xf32>
    %c96_i32_62 = arith.constant 96 : i32
    %190 = tpu.dynamic_rotate %187 by %c96_i32_62 dim 1 : vector<8x128xf32>, i32 -> vector<8x128xf32>
    %191 = vector.extract_strided_slice %190 {offsets = [0, 0], sizes = [8, 32], strides = [1, 1]} : vector<8x128xf32> to vector<8x32xf32>
    %c64_i32_63 = arith.constant 64 : i32
    %192 = tpu.dynamic_rotate %188 by %c64_i32_63 dim 1 : vector<8x128xf32>, i32 -> vector<8x128xf32>
    %193 = vector.extract_strided_slice %192 {offsets = [0, 0], sizes = [8, 32], strides = [1, 1]} : vector<8x128xf32> to vector<8x32xf32>
    %c32_i32_64 = arith.constant 32 : i32
    %194 = tpu.dynamic_rotate %187 by %c32_i32_64 dim 1 : vector<8x128xf32>, i32 -> vector<8x128xf32>
    %195 = vector.extract_strided_slice %194 {offsets = [0, 0], sizes = [8, 32], strides = [1, 1]} : vector<8x128xf32> to vector<8x32xf32>
    %196 = arith.mulf %191, %153 : vector<8x32xf32>
    %197 = arith.mulf %189, %193 : vector<8x32xf32>
    %198 = arith.addf %196, %197 : vector<8x32xf32>
    %199 = math.tanh %198 : vector<8x32xf32>
    %200 = arith.mulf %195, %199 : vector<8x32xf32>
    %201 = arith.truncf %200 : vector<8x32xf32> to vector<8x32xbf16>
    %cst_65 = arith.constant dense<0.000000e+00> : vector<8x128xf32>
    %202 = tpu.matmul %178, %1, %cst_65 {dimension_numbers = #tpu.dot_dimension_numbers<[1], [0], [0], [1], [0, 0, 1, 1], [], []>} : vector<8x32xbf16>, vector<32x128xbf16>, vector<8x128xf32> -> vector<8x128xf32>
    %c32 = arith.constant 32 : index
    %c0_66 = arith.constant 0 : index
    %203 = vector.load %arg8[%c32, %c0_66] : memref<64x128xf32, #tpu.memory_space<vmem>>, vector<8x128xf32>
    %204 = arith.addf %203, %202 : vector<8x128xf32>
    %205 = arith.negf %204 : vector<8x128xf32>
    %206 = math.exp %205 : vector<8x128xf32>
    %cst_67 = arith.constant 1.000000e+00 : f32
    %207 = vector.broadcast %cst_67 : f32 to vector<8x128xf32>
    %208 = arith.addf %207, %206 : vector<8x128xf32>
    %209 = arith.divf %207, %208 : vector<8x128xf32>
    %210 = math.tanh %204 : vector<8x128xf32>
    %211 = vector.extract_strided_slice %209 {offsets = [0, 0], sizes = [8, 32], strides = [1, 1]} : vector<8x128xf32> to vector<8x32xf32>
    %c96_i32_68 = arith.constant 96 : i32
    %212 = tpu.dynamic_rotate %209 by %c96_i32_68 dim 1 : vector<8x128xf32>, i32 -> vector<8x128xf32>
    %213 = vector.extract_strided_slice %212 {offsets = [0, 0], sizes = [8, 32], strides = [1, 1]} : vector<8x128xf32> to vector<8x32xf32>
    %c64_i32_69 = arith.constant 64 : i32
    %214 = tpu.dynamic_rotate %210 by %c64_i32_69 dim 1 : vector<8x128xf32>, i32 -> vector<8x128xf32>
    %215 = vector.extract_strided_slice %214 {offsets = [0, 0], sizes = [8, 32], strides = [1, 1]} : vector<8x128xf32> to vector<8x32xf32>
    %c32_i32_70 = arith.constant 32 : i32
    %216 = tpu.dynamic_rotate %209 by %c32_i32_70 dim 1 : vector<8x128xf32>, i32 -> vector<8x128xf32>
    %217 = vector.extract_strided_slice %216 {offsets = [0, 0], sizes = [8, 32], strides = [1, 1]} : vector<8x128xf32> to vector<8x32xf32>
    %218 = arith.mulf %213, %175 : vector<8x32xf32>
    %219 = arith.mulf %211, %215 : vector<8x32xf32>
    %220 = arith.addf %218, %219 : vector<8x32xf32>
    %221 = math.tanh %220 : vector<8x32xf32>
    %222 = arith.mulf %217, %221 : vector<8x32xf32>
    %223 = arith.truncf %222 : vector<8x32xf32> to vector<8x32xbf16>
    %cst_71 = arith.constant dense<0.000000e+00> : vector<8x128xf32>
    %224 = tpu.matmul %201, %3, %cst_71 {dimension_numbers = #tpu.dot_dimension_numbers<[1], [0], [0], [1], [0, 0, 1, 1], [], []>} : vector<8x32xbf16>, vector<32x128xbf16>, vector<8x128xf32> -> vector<8x128xf32>
    %cst_72 = arith.constant dense<0.000000e+00> : vector<8x128xf32>
    %225 = tpu.matmul %223, %5, %cst_72 {dimension_numbers = #tpu.dot_dimension_numbers<[1], [0], [0], [1], [0, 0, 1, 1], [], []>} : vector<8x32xbf16>, vector<32x128xbf16>, vector<8x128xf32> -> vector<8x128xf32>
    %226 = arith.addf %225, %224 : vector<8x128xf32>
    %227 = arith.addf %226, %8 : vector<8x128xf32>
    %228 = arith.negf %227 : vector<8x128xf32>
    %229 = math.exp %228 : vector<8x128xf32>
    %cst_73 = arith.constant 1.000000e+00 : f32
    %230 = vector.broadcast %cst_73 : f32 to vector<8x128xf32>
    %231 = arith.addf %230, %229 : vector<8x128xf32>
    %232 = arith.divf %230, %231 : vector<8x128xf32>
    %233 = math.tanh %227 : vector<8x128xf32>
    %234 = vector.extract_strided_slice %232 {offsets = [0, 0], sizes = [8, 32], strides = [1, 1]} : vector<8x128xf32> to vector<8x32xf32>
    %c96_i32_74 = arith.constant 96 : i32
    %235 = tpu.dynamic_rotate %232 by %c96_i32_74 dim 1 : vector<8x128xf32>, i32 -> vector<8x128xf32>
    %236 = vector.extract_strided_slice %235 {offsets = [0, 0], sizes = [8, 32], strides = [1, 1]} : vector<8x128xf32> to vector<8x32xf32>
    %c64_i32_75 = arith.constant 64 : i32
    %237 = tpu.dynamic_rotate %233 by %c64_i32_75 dim 1 : vector<8x128xf32>, i32 -> vector<8x128xf32>
    %238 = vector.extract_strided_slice %237 {offsets = [0, 0], sizes = [8, 32], strides = [1, 1]} : vector<8x128xf32> to vector<8x32xf32>
    %c32_i32_76 = arith.constant 32 : i32
    %239 = tpu.dynamic_rotate %232 by %c32_i32_76 dim 1 : vector<8x128xf32>, i32 -> vector<8x128xf32>
    %240 = vector.extract_strided_slice %239 {offsets = [0, 0], sizes = [8, 32], strides = [1, 1]} : vector<8x128xf32> to vector<8x32xf32>
    %241 = arith.mulf %236, %198 : vector<8x32xf32>
    %242 = arith.mulf %234, %238 : vector<8x32xf32>
    %243 = arith.addf %241, %242 : vector<8x32xf32>
    %244 = math.tanh %243 : vector<8x32xf32>
    %245 = arith.mulf %240, %244 : vector<8x32xf32>
    %246 = arith.truncf %245 : vector<8x32xf32> to vector<8x32xbf16>
    %cst_77 = arith.constant dense<0.000000e+00> : vector<8x128xf32>
    %247 = tpu.matmul %223, %1, %cst_77 {dimension_numbers = #tpu.dot_dimension_numbers<[1], [0], [0], [1], [0, 0, 1, 1], [], []>} : vector<8x32xbf16>, vector<32x128xbf16>, vector<8x128xf32> -> vector<8x128xf32>
    %c40 = arith.constant 40 : index
    %c0_78 = arith.constant 0 : index
    %248 = vector.load %arg8[%c40, %c0_78] : memref<64x128xf32, #tpu.memory_space<vmem>>, vector<8x128xf32>
    %249 = arith.addf %248, %247 : vector<8x128xf32>
    %250 = arith.negf %249 : vector<8x128xf32>
    %251 = math.exp %250 : vector<8x128xf32>
    %cst_79 = arith.constant 1.000000e+00 : f32
    %252 = vector.broadcast %cst_79 : f32 to vector<8x128xf32>
    %253 = arith.addf %252, %251 : vector<8x128xf32>
    %254 = arith.divf %252, %253 : vector<8x128xf32>
    %255 = math.tanh %249 : vector<8x128xf32>
    %256 = vector.extract_strided_slice %254 {offsets = [0, 0], sizes = [8, 32], strides = [1, 1]} : vector<8x128xf32> to vector<8x32xf32>
    %c96_i32_80 = arith.constant 96 : i32
    %257 = tpu.dynamic_rotate %254 by %c96_i32_80 dim 1 : vector<8x128xf32>, i32 -> vector<8x128xf32>
    %258 = vector.extract_strided_slice %257 {offsets = [0, 0], sizes = [8, 32], strides = [1, 1]} : vector<8x128xf32> to vector<8x32xf32>
    %c64_i32_81 = arith.constant 64 : i32
    %259 = tpu.dynamic_rotate %255 by %c64_i32_81 dim 1 : vector<8x128xf32>, i32 -> vector<8x128xf32>
    %260 = vector.extract_strided_slice %259 {offsets = [0, 0], sizes = [8, 32], strides = [1, 1]} : vector<8x128xf32> to vector<8x32xf32>
    %c32_i32_82 = arith.constant 32 : i32
    %261 = tpu.dynamic_rotate %254 by %c32_i32_82 dim 1 : vector<8x128xf32>, i32 -> vector<8x128xf32>
    %262 = vector.extract_strided_slice %261 {offsets = [0, 0], sizes = [8, 32], strides = [1, 1]} : vector<8x128xf32> to vector<8x32xf32>
    %263 = arith.mulf %258, %220 : vector<8x32xf32>
    %264 = arith.mulf %256, %260 : vector<8x32xf32>
    %265 = arith.addf %263, %264 : vector<8x32xf32>
    %266 = math.tanh %265 : vector<8x32xf32>
    %267 = arith.mulf %262, %266 : vector<8x32xf32>
    %268 = arith.truncf %267 : vector<8x32xf32> to vector<8x32xbf16>
    %cst_83 = arith.constant dense<0.000000e+00> : vector<8x128xf32>
    %269 = tpu.matmul %246, %3, %cst_83 {dimension_numbers = #tpu.dot_dimension_numbers<[1], [0], [0], [1], [0, 0, 1, 1], [], []>} : vector<8x32xbf16>, vector<32x128xbf16>, vector<8x128xf32> -> vector<8x128xf32>
    %cst_84 = arith.constant dense<0.000000e+00> : vector<8x128xf32>
    %270 = tpu.matmul %268, %5, %cst_84 {dimension_numbers = #tpu.dot_dimension_numbers<[1], [0], [0], [1], [0, 0, 1, 1], [], []>} : vector<8x32xbf16>, vector<32x128xbf16>, vector<8x128xf32> -> vector<8x128xf32>
    %271 = arith.addf %270, %269 : vector<8x128xf32>
    %272 = arith.addf %271, %8 : vector<8x128xf32>
    %273 = arith.negf %272 : vector<8x128xf32>
    %274 = math.exp %273 : vector<8x128xf32>
    %cst_85 = arith.constant 1.000000e+00 : f32
    %275 = vector.broadcast %cst_85 : f32 to vector<8x128xf32>
    %276 = arith.addf %275, %274 : vector<8x128xf32>
    %277 = arith.divf %275, %276 : vector<8x128xf32>
    %278 = math.tanh %272 : vector<8x128xf32>
    %279 = vector.extract_strided_slice %277 {offsets = [0, 0], sizes = [8, 32], strides = [1, 1]} : vector<8x128xf32> to vector<8x32xf32>
    %c96_i32_86 = arith.constant 96 : i32
    %280 = tpu.dynamic_rotate %277 by %c96_i32_86 dim 1 : vector<8x128xf32>, i32 -> vector<8x128xf32>
    %281 = vector.extract_strided_slice %280 {offsets = [0, 0], sizes = [8, 32], strides = [1, 1]} : vector<8x128xf32> to vector<8x32xf32>
    %c64_i32_87 = arith.constant 64 : i32
    %282 = tpu.dynamic_rotate %278 by %c64_i32_87 dim 1 : vector<8x128xf32>, i32 -> vector<8x128xf32>
    %283 = vector.extract_strided_slice %282 {offsets = [0, 0], sizes = [8, 32], strides = [1, 1]} : vector<8x128xf32> to vector<8x32xf32>
    %c32_i32_88 = arith.constant 32 : i32
    %284 = tpu.dynamic_rotate %277 by %c32_i32_88 dim 1 : vector<8x128xf32>, i32 -> vector<8x128xf32>
    %285 = vector.extract_strided_slice %284 {offsets = [0, 0], sizes = [8, 32], strides = [1, 1]} : vector<8x128xf32> to vector<8x32xf32>
    %286 = arith.mulf %281, %243 : vector<8x32xf32>
    %287 = arith.mulf %279, %283 : vector<8x32xf32>
    %288 = arith.addf %286, %287 : vector<8x32xf32>
    %289 = math.tanh %288 : vector<8x32xf32>
    %290 = arith.mulf %285, %289 : vector<8x32xf32>
    %291 = arith.truncf %290 : vector<8x32xf32> to vector<8x32xbf16>
    %cst_89 = arith.constant dense<0.000000e+00> : vector<8x128xf32>
    %292 = tpu.matmul %268, %1, %cst_89 {dimension_numbers = #tpu.dot_dimension_numbers<[1], [0], [0], [1], [0, 0, 1, 1], [], []>} : vector<8x32xbf16>, vector<32x128xbf16>, vector<8x128xf32> -> vector<8x128xf32>
    %c48 = arith.constant 48 : index
    %c0_90 = arith.constant 0 : index
    %293 = vector.load %arg8[%c48, %c0_90] : memref<64x128xf32, #tpu.memory_space<vmem>>, vector<8x128xf32>
    %294 = arith.addf %293, %292 : vector<8x128xf32>
    %295 = arith.negf %294 : vector<8x128xf32>
    %296 = math.exp %295 : vector<8x128xf32>
    %cst_91 = arith.constant 1.000000e+00 : f32
    %297 = vector.broadcast %cst_91 : f32 to vector<8x128xf32>
    %298 = arith.addf %297, %296 : vector<8x128xf32>
    %299 = arith.divf %297, %298 : vector<8x128xf32>
    %300 = math.tanh %294 : vector<8x128xf32>
    %301 = vector.extract_strided_slice %299 {offsets = [0, 0], sizes = [8, 32], strides = [1, 1]} : vector<8x128xf32> to vector<8x32xf32>
    %c96_i32_92 = arith.constant 96 : i32
    %302 = tpu.dynamic_rotate %299 by %c96_i32_92 dim 1 : vector<8x128xf32>, i32 -> vector<8x128xf32>
    %303 = vector.extract_strided_slice %302 {offsets = [0, 0], sizes = [8, 32], strides = [1, 1]} : vector<8x128xf32> to vector<8x32xf32>
    %c64_i32_93 = arith.constant 64 : i32
    %304 = tpu.dynamic_rotate %300 by %c64_i32_93 dim 1 : vector<8x128xf32>, i32 -> vector<8x128xf32>
    %305 = vector.extract_strided_slice %304 {offsets = [0, 0], sizes = [8, 32], strides = [1, 1]} : vector<8x128xf32> to vector<8x32xf32>
    %c32_i32_94 = arith.constant 32 : i32
    %306 = tpu.dynamic_rotate %299 by %c32_i32_94 dim 1 : vector<8x128xf32>, i32 -> vector<8x128xf32>
    %307 = vector.extract_strided_slice %306 {offsets = [0, 0], sizes = [8, 32], strides = [1, 1]} : vector<8x128xf32> to vector<8x32xf32>
    %308 = arith.mulf %303, %265 : vector<8x32xf32>
    %309 = arith.mulf %301, %305 : vector<8x32xf32>
    %310 = arith.addf %308, %309 : vector<8x32xf32>
    %311 = math.tanh %310 : vector<8x32xf32>
    %312 = arith.mulf %307, %311 : vector<8x32xf32>
    %313 = arith.truncf %312 : vector<8x32xf32> to vector<8x32xbf16>
    %cst_95 = arith.constant dense<0.000000e+00> : vector<8x128xf32>
    %314 = tpu.matmul %291, %3, %cst_95 {dimension_numbers = #tpu.dot_dimension_numbers<[1], [0], [0], [1], [0, 0, 1, 1], [], []>} : vector<8x32xbf16>, vector<32x128xbf16>, vector<8x128xf32> -> vector<8x128xf32>
    %cst_96 = arith.constant dense<0.000000e+00> : vector<8x128xf32>
    %315 = tpu.matmul %313, %5, %cst_96 {dimension_numbers = #tpu.dot_dimension_numbers<[1], [0], [0], [1], [0, 0, 1, 1], [], []>} : vector<8x32xbf16>, vector<32x128xbf16>, vector<8x128xf32> -> vector<8x128xf32>
    %316 = arith.addf %315, %314 : vector<8x128xf32>
    %317 = arith.addf %316, %8 : vector<8x128xf32>
    %318 = arith.negf %317 : vector<8x128xf32>
    %319 = math.exp %318 : vector<8x128xf32>
    %cst_97 = arith.constant 1.000000e+00 : f32
    %320 = vector.broadcast %cst_97 : f32 to vector<8x128xf32>
    %321 = arith.addf %320, %319 : vector<8x128xf32>
    %322 = arith.divf %320, %321 : vector<8x128xf32>
    %323 = math.tanh %317 : vector<8x128xf32>
    %324 = vector.extract_strided_slice %322 {offsets = [0, 0], sizes = [8, 32], strides = [1, 1]} : vector<8x128xf32> to vector<8x32xf32>
    %c96_i32_98 = arith.constant 96 : i32
    %325 = tpu.dynamic_rotate %322 by %c96_i32_98 dim 1 : vector<8x128xf32>, i32 -> vector<8x128xf32>
    %326 = vector.extract_strided_slice %325 {offsets = [0, 0], sizes = [8, 32], strides = [1, 1]} : vector<8x128xf32> to vector<8x32xf32>
    %c64_i32_99 = arith.constant 64 : i32
    %327 = tpu.dynamic_rotate %323 by %c64_i32_99 dim 1 : vector<8x128xf32>, i32 -> vector<8x128xf32>
    %328 = vector.extract_strided_slice %327 {offsets = [0, 0], sizes = [8, 32], strides = [1, 1]} : vector<8x128xf32> to vector<8x32xf32>
    %c32_i32_100 = arith.constant 32 : i32
    %329 = tpu.dynamic_rotate %322 by %c32_i32_100 dim 1 : vector<8x128xf32>, i32 -> vector<8x128xf32>
    %330 = vector.extract_strided_slice %329 {offsets = [0, 0], sizes = [8, 32], strides = [1, 1]} : vector<8x128xf32> to vector<8x32xf32>
    %331 = arith.mulf %326, %288 : vector<8x32xf32>
    %332 = arith.mulf %324, %328 : vector<8x32xf32>
    %333 = arith.addf %331, %332 : vector<8x32xf32>
    %334 = math.tanh %333 : vector<8x32xf32>
    %335 = arith.mulf %330, %334 : vector<8x32xf32>
    %336 = arith.truncf %335 : vector<8x32xf32> to vector<8x32xbf16>
    %cst_101 = arith.constant dense<0.000000e+00> : vector<8x128xf32>
    %337 = tpu.matmul %313, %1, %cst_101 {dimension_numbers = #tpu.dot_dimension_numbers<[1], [0], [0], [1], [0, 0, 1, 1], [], []>} : vector<8x32xbf16>, vector<32x128xbf16>, vector<8x128xf32> -> vector<8x128xf32>
    %c56 = arith.constant 56 : index
    %c0_102 = arith.constant 0 : index
    %338 = vector.load %arg8[%c56, %c0_102] : memref<64x128xf32, #tpu.memory_space<vmem>>, vector<8x128xf32>
    %339 = arith.addf %338, %337 : vector<8x128xf32>
    %340 = arith.negf %339 : vector<8x128xf32>
    %341 = math.exp %340 : vector<8x128xf32>
    %cst_103 = arith.constant 1.000000e+00 : f32
    %342 = vector.broadcast %cst_103 : f32 to vector<8x128xf32>
    %343 = arith.addf %342, %341 : vector<8x128xf32>
    %344 = arith.divf %342, %343 : vector<8x128xf32>
    %345 = math.tanh %339 : vector<8x128xf32>
    %346 = vector.extract_strided_slice %344 {offsets = [0, 0], sizes = [8, 32], strides = [1, 1]} : vector<8x128xf32> to vector<8x32xf32>
    %c96_i32_104 = arith.constant 96 : i32
    %347 = tpu.dynamic_rotate %344 by %c96_i32_104 dim 1 : vector<8x128xf32>, i32 -> vector<8x128xf32>
    %348 = vector.extract_strided_slice %347 {offsets = [0, 0], sizes = [8, 32], strides = [1, 1]} : vector<8x128xf32> to vector<8x32xf32>
    %c64_i32_105 = arith.constant 64 : i32
    %349 = tpu.dynamic_rotate %345 by %c64_i32_105 dim 1 : vector<8x128xf32>, i32 -> vector<8x128xf32>
    %350 = vector.extract_strided_slice %349 {offsets = [0, 0], sizes = [8, 32], strides = [1, 1]} : vector<8x128xf32> to vector<8x32xf32>
    %c32_i32_106 = arith.constant 32 : i32
    %351 = tpu.dynamic_rotate %344 by %c32_i32_106 dim 1 : vector<8x128xf32>, i32 -> vector<8x128xf32>
    %352 = vector.extract_strided_slice %351 {offsets = [0, 0], sizes = [8, 32], strides = [1, 1]} : vector<8x128xf32> to vector<8x32xf32>
    %353 = arith.mulf %348, %310 : vector<8x32xf32>
    %354 = arith.mulf %346, %350 : vector<8x32xf32>
    %355 = arith.addf %353, %354 : vector<8x32xf32>
    %356 = math.tanh %355 : vector<8x32xf32>
    %357 = arith.mulf %352, %356 : vector<8x32xf32>
    %358 = arith.truncf %357 : vector<8x32xf32> to vector<8x32xbf16>
    %cst_107 = arith.constant dense<0.000000e+00> : vector<8x128xf32>
    %359 = tpu.matmul %336, %3, %cst_107 {dimension_numbers = #tpu.dot_dimension_numbers<[1], [0], [0], [1], [0, 0, 1, 1], [], []>} : vector<8x32xbf16>, vector<32x128xbf16>, vector<8x128xf32> -> vector<8x128xf32>
    %cst_108 = arith.constant dense<0.000000e+00> : vector<8x128xf32>
    %360 = tpu.matmul %358, %5, %cst_108 {dimension_numbers = #tpu.dot_dimension_numbers<[1], [0], [0], [1], [0, 0, 1, 1], [], []>} : vector<8x32xbf16>, vector<32x128xbf16>, vector<8x128xf32> -> vector<8x128xf32>
    %361 = arith.addf %360, %359 : vector<8x128xf32>
    %362 = arith.addf %361, %8 : vector<8x128xf32>
    %363 = arith.negf %362 : vector<8x128xf32>
    %364 = math.exp %363 : vector<8x128xf32>
    %cst_109 = arith.constant 1.000000e+00 : f32
    %365 = vector.broadcast %cst_109 : f32 to vector<8x128xf32>
    %366 = arith.addf %365, %364 : vector<8x128xf32>
    %367 = arith.divf %365, %366 : vector<8x128xf32>
    %368 = math.tanh %362 : vector<8x128xf32>
    %369 = vector.extract_strided_slice %367 {offsets = [0, 0], sizes = [8, 32], strides = [1, 1]} : vector<8x128xf32> to vector<8x32xf32>
    %c96_i32_110 = arith.constant 96 : i32
    %370 = tpu.dynamic_rotate %367 by %c96_i32_110 dim 1 : vector<8x128xf32>, i32 -> vector<8x128xf32>
    %371 = vector.extract_strided_slice %370 {offsets = [0, 0], sizes = [8, 32], strides = [1, 1]} : vector<8x128xf32> to vector<8x32xf32>
    %c64_i32_111 = arith.constant 64 : i32
    %372 = tpu.dynamic_rotate %368 by %c64_i32_111 dim 1 : vector<8x128xf32>, i32 -> vector<8x128xf32>
    %373 = vector.extract_strided_slice %372 {offsets = [0, 0], sizes = [8, 32], strides = [1, 1]} : vector<8x128xf32> to vector<8x32xf32>
    %c32_i32_112 = arith.constant 32 : i32
    %374 = tpu.dynamic_rotate %367 by %c32_i32_112 dim 1 : vector<8x128xf32>, i32 -> vector<8x128xf32>
    %375 = vector.extract_strided_slice %374 {offsets = [0, 0], sizes = [8, 32], strides = [1, 1]} : vector<8x128xf32> to vector<8x32xf32>
    %376 = arith.mulf %371, %333 : vector<8x32xf32>
    %377 = arith.mulf %369, %373 : vector<8x32xf32>
    %378 = arith.addf %376, %377 : vector<8x32xf32>
    %379 = math.tanh %378 : vector<8x32xf32>
    %380 = arith.mulf %375, %379 : vector<8x32xf32>
    %c0_113 = arith.constant 0 : index
    %c0_114 = arith.constant 0 : index
    %381 = vector.load %arg7[%c0_113, %c0_114] : memref<8x32xf32, #tpu.memory_space<vmem>>, vector<8x32xf32>
    tpu.vector_store %arg7[%c0_113, %c0_114], %380 {strides = array<i32>} : memref<8x32xf32, #tpu.memory_space<vmem>>, vector<8x32xf32>,
    return
  }
}

</mosaic_0001>

<bundles_post_ra>
// kernel: lstm_forward_pallas.1
= control target key start
LH: loop header
LB: loop body
LE: loop exit
PB: predicated region body
PF: predicated region fallthrough
CT: control target
= control target key end

     0   :  { %v1960_v0 = vmov 0.0   ;;  %vm1961_vm0 = vmmov 0   ;;  %vm74_vm1 = vcmask 130048   ;;  %v1962_v16 = vmov 0   ;;  %s1964_s20 = smov 96   ;;  %s2406_s1 = inlined_call_operand.vmem [shape: f32[16,128], index: 1, kind: input, shape index: {}]   ;;  %s2407_s2 = inlined_call_operand.vmem [shape: f32[32,128], index: 2, kind: input, shape index: {}]   ;;  %s2408_s0 = inlined_call_operand.vmem [shape: f32[64,16], index: 0, kind: input, shape index: {}]   ;;  %s2409_s3 = inlined_call_operand.vmem [shape: f32[1,128], index: 3, kind: input, shape index: {}]   ;;  %s2410_s4 = inlined_call_operand.vmem [shape: f32[32,128], index: 4, kind: input, shape index: {}]   ;;  %s2411_s5 = inlined_call_operand.vmem [shape: f32[32,128], index: 5, kind: input, shape index: {}]   ;;  %s2412_s6 = inlined_call_operand.vmem [shape: f32[1,128], index: 6, kind: input, shape index: {}]   ;;  %s2413_s7 = inlined_call_operand.vmem [shape: f32[8,32], index: 7, kind: output, shape index: {}]  }
   0x1   :  { %1632 = vmatprep.subr.bf16.mxu1 %v1960_v0  ;;  %v64_v1 = vld [vmem:[%s2406_s1] sm:$0xff]  ;;  %v65_v2 = vld [vmem:[%s2406_s1 + $0x8] sm:$0xff]  ;;  %v29_v3 = vld [vmem:[%s2407_s2 + $0x10] sm:$0xff]  ;;  %1636 = vmatprep.mubr.msk.bf16.mxu1 %vm1961_vm0, %v1960_v0  ;;  %vm160_vm2 = vcmask 261120  }
   0x2   :  { %v66_v4 = vpack.c.bf16 %v65_v2, %v64_v1  ;;  %v30_v5 = vld [vmem:[%s2407_s2 + $0x18] sm:$0xff]  ;;  %v52_v6 = vld [vmem:[%s2408_s0] sm:$0xff]  ;;  %v53_v7 = vld [vmem:[%s2408_s0 + $0x8] sm:$0xff] }
   0x3   :  { %v2027_v8 = vpack.c.bf16 %v30_v5, %v29_v3  ;;  %v60_v9 = vpack.c.bf16 %v53_v7, %v52_v6  ;;  %v54_v10 = vld [vmem:[%s2408_s0 + $0x10] sm:$0xff]  ;;  %v55_v11 = vld [vmem:[%s2408_s0 + $0x18] sm:$0xff]  ;;  %v27_v12 = vld [vmem:[%s2407_s2] sm:$0xff] }
   0x4   :  { %1622 = vmatprep.subr.bf16.mxu0 %v66_v4  ;;  %v61_v13 = vpack.c.bf16 %v55_v11, %v54_v10  ;;  %v28_v14 = vld [vmem:[%s2407_s2 + $0x8] sm:$0xff]  ;;  %v2057_v18 = vld [vmem:[%s2409_s3] ss:$0 sm:$0xff]  ;;  %v58_v31 = vld [vmem:[%s2408_s0 + $0x30] sm:$0xff] }
   0x5   :  { %1633 = vmatpush3.bf16.msra.mxu1 %v2027_v8  ;;  %1623 = vmatpush3.bf16.msra.mxu0 %v66_v4  ;;  %v2042_v15 = vpack.c.bf16 %v28_v14, %v27_v12  ;;  %v56_v29 = vld [vmem:[%s2408_s0 + $0x20] sm:$0xff]  ;;  %v57_v30 = vld [vmem:[%s2408_s0 + $0x28] sm:$0xff]  ;;  %v41_v32 = vld [vmem:[%s2410_s4 + $0x10] sm:$0xff] }
   0x6   :  { %1624 = vmatprep.mubr.msk.bf16.mxu0 %vm74_vm1, %v60_v9  ;;  %1634 = vmatprep.subr.bf16.mxu1 %v1960_v0  ;;  %v42_v33 = vld [vmem:[%s2410_s4 + $0x18] sm:$0xff]  ;;  %v62_v34 = vpack.c.bf16 %v57_v30, %v56_v29  ;;  %v35_v35 = vld [vmem:[%s2411_s5 + $0x10] sm:$0xff]  ;;  %v33_v39 = vld [vmem:[%s2411_s5] sm:$0xff] }
   0x7   :  { %1648 = vmatprep.subr.bf16.mxu0 %v1960_v0  ;;  %v2078_v36 = vpack.c.bf16 %v42_v33, %v41_v32  ;;  %v36_v37 = vld [vmem:[%s2411_s5 + $0x18] sm:$0xff]  ;;  %v34_v42 = vld [vmem:[%s2411_s5 + $0x8] sm:$0xff]  ;;  %v39_v43 = vld [vmem:[%s2410_s4] sm:$0xff] }
   0x8   :  { %1625 = vmatmul.mubr.msk.bf16.vlgmr.msra.gmra.mxu0 %vm74_vm1, %v61_v13  ;;  %v59_v38 = vld [vmem:[%s2408_s0 + $0x38] sm:$0xff]  ;;  %v2090_v40 = vpack.c.bf16 %v36_v37, %v35_v35  ;;  %v40_v44 = vld [vmem:[%s2410_s4 + $0x8] sm:$0xff]  ;;  %s1963_s0 = smov 32   ;;  %v2108_v47 = vpack.c.bf16 %v34_v42, %v33_v39  ;;  %s1965_s4 = smov 64   ;;  %v2156_v6 = vld [vmem:[%s2412_s6] ss:$0 sm:$0xff] }
   0x9   :  { %1635 = vmatpush3.bf16.msra.mxu1 %v2042_v15  ;;  %1628 = vmatprep.mubr.msk.bf16.mxu0 %vm74_vm1, %v62_v34  ;;  %v63_v41 = vpack.c.bf16 %v59_v38, %v58_v31  ;;  %v2102_v46 = vpack.c.bf16 %v40_v44, %v39_v43 }
   0xa   :  { %1640 = vmatprep.subr.bf16.mxu1 %v1960_v0  ;;  %1649 = vmatpush3.bf16.msra.mxu0 %v2078_v36 }
   0xb   :  { %1650 = vmatprep.subr.bf16.mxu0 %v1960_v0 }
   0xc   :  { %1637 = vmatmul.mubr.bf16.vlgmr.msra.gmra.mxu1 %v1962_v16 }
   0xd   :  { %1644 = vmatprep.mubr.msk.bf16.mxu1 %vm1961_vm0, %v1960_v0  ;;  %1641 = vmatpush3.bf16.msra.mxu1 %v2090_v40 }
   0xe   :  { %1642 = vmatprep.subr.bf16.mxu1 %v1960_v0  ;;  %1651 = vmatpush3.bf16.msra.mxu0 %v2102_v46 }
   0xf   :  { %1664 = vmatprep.subr.bf16.mxu0 %v1960_v0 }
  0x10   :  { %1629 = vmatmul.mubr.msk.bf16.gmra.mxu0 %vm74_vm1, %v63_v41 }
  0x11   :  { %1652 = vmatprep.mubr.msk.bf16.mxu0 %vm1961_vm0, %v1960_v0  ;;  %1643 = vmatpush3.bf16.msra.mxu1 %v2108_v47 }
  0x12   :  { %1656 = vmatprep.subr.bf16.mxu1 %v1960_v0 }
  0x14   :  { %1645 = vmatmul.mubr.bf16.vlgmr.msra.gmra.mxu1 %v1962_v16 }
  0x15   :  { %1657 = vmatpush3.bf16.msra.mxu1 %v2027_v8  ;;  %1660 = vmatprep.mubr.msk.bf16.mxu1 %vm1961_vm0, %v1960_v0 }
  0x16   :  { %1658 = vmatprep.subr.bf16.mxu1 %v1960_v0 }
  0x19   :  { %1659 = vmatpush3.bf16.msra.mxu1 %v2042_v15 }
  0x1a   :  { %1672 = vmatprep.subr.bf16.mxu1 %v1960_v0 }
  0xc8   :  { %v2052_v17 = vpop.f32.mrf.mxu0 }
  0xca   :  { %v121_v19 = vpop.f32.mrf.mxu0 }
  0xcb   :  { %v122_v20 = vadd.f32 %v2057_v18, %v121_v19 }
  0xcc   :  { %v198_v21 = vpop.f32.mrf.mxu1  ;;  %v2142_v62 = vpop.f32.mrf.mxu0 }
  0xcd   :  { %v205_v22 = vadd.f32 %v198_v21, %v122_v20 }
  0xce   :  { %v1638_v23 = vpop.f32.mrf.mxu1  ;;  %v124_v63 = vpop.f32.mrf.mxu0 }
  0xcf   :  { %v1507_v24 = vmul.f32 -1.442695, %v205_v22  ;;  %v125_v5 = vadd.f32 %v2057_v18, %v124_v63 }
  0xd0   :  { %v201_v25 = vpop.f32.mrf.mxu1  ;;  %v2144_v1 = vpop.f32.mrf.mxu0 }
  0xd1   :  { %1830 = vpow2.f32 %v1507_v24 }
  0xd2   :  { %v1639_v26 = vpop.f32.mrf.mxu1  ;;  %v2146_v2 = vpop.f32.mrf.mxu0 }
  0xd4   :  { %v259_v58 = vpop.f32.mrf.mxu1  ;;  %v2148_v3 = vpop.f32.mrf.mxu0 }
  0xd6   :  { %v1646_v59 = vpop.f32.mrf.mxu1  ;;  %v2150_v4 = vpop.f32.mrf.mxu0 }
  0xd8   :  { %v262_v60 = vpop.f32.mrf.mxu1 }
  0xda   :  { %v1647_v61 = vpop.f32.mrf.mxu1 }
  0xdb   :  { %v130_v61 = vadd.f32 %v2052_v17, %v2057_v18 }
  0xde   :  { %v1831_v27 = vpop.eup %1830 }
  0xdf   :  { %v209_v28 = vadd.f32 1.0, %v1831_v27 }
  0xe1   :  { %1832 = vrcp.f32 %v209_v28 }
  0xe2   :  { %1834 = vtanh.f32 %v205_v22 }
  0xee   :  { %v1833_v45 = vpop.eup %1832 }
  0xef   :  { %217 = vrot.lane.b32.xlu1 %v1833_v45, %s1963_s0  ;;  %213 = vrot.lane.b32.xlu0 %v1833_v45, %s1964_s20  ;;  %v1835_v48 = vpop.eup %1834 }
  0xf3   :  { %215 = vrot.lane.b32.xlu0 %v1835_v48, %s1965_s4 }
 0x161   :  { %v214_v49 = vpop.permute.xlu0 %213  ;;  %v218_v55 = vpop.permute.xlu1 %217 }
 0x162   :  { %v219_v51 = vmul.f32 0.0, %v214_v49 }
 0x165   :  { %v216_v50 = vpop.permute.xlu0 %215 }
 0x166   :  { %v220_v52 = vmul.f32 %v1833_v45, %v216_v50 }
 0x168   :  { %v2125_v53 = vadd.f32 %v220_v52, %v219_v51 }
 0x16a   :  { %1836 = vtanh.f32 %v2125_v53 }
 0x177   :  { %v1837_v54 = vpop.eup %1836 }
 0x178   :  { %v223_v56 = vmul.f32 %v1837_v54, %v218_v55 }
 0x17a   :  { %v224_v57 = vpack.c.bf16 %v223_v56, %v223_v56 }
 0x17c   :  { %1653 = vmatmul.mubr.msk.bf16.vlgmr.msra.gmra.mxu0 %vm160_vm2, %v224_v57  ;;  %1661 = vmatmul.mubr.msk.bf16.vlgmr.msra.gmra.mxu1 %vm160_vm2, %v224_v57 }
 0x17d   :  { %1665 = vmatpush3.bf16.msra.mxu0 %v2090_v40  ;;  %1673 = vmatpush3.bf16.msra.mxu1 %v2078_v36 }
 0x17e   :  { %1666 = vmatprep.subr.bf16.mxu0 %v1960_v0  ;;  %1668 = vmatprep.mubr.msk.bf16.mxu0 %vm1961_vm0, %v1960_v0 }
 0x17f   :  { %1674 = vmatprep.subr.bf16.mxu1 %v1960_v0  ;;  %1676 = vmatprep.mubr.msk.bf16.mxu1 %vm1961_vm0, %v1960_v0 }
 0x181   :  { %1667 = vmatpush3.bf16.msra.mxu0 %v2108_v47  ;;  %1675 = vmatpush3.bf16.msra.mxu1 %v2102_v46 }
 0x182   :  { %1680 = vmatprep.subr.bf16.mxu0 %v1960_v0  ;;  %1688 = vmatprep.subr.bf16.mxu1 %v1960_v0 }
 0x23c   :  { %v302_v7 = vpop.f32.mrf.mxu0  ;;  %v362_v9 = vpop.f32.mrf.mxu1 }
 0x23d   :  { %v303_v10 = vadd.f32 %v302_v7, %v259_v58  ;;  %v369_v11 = vadd.f32 %v362_v9, %v125_v5 }
 0x23e   :  { %v1654_v12 = vpop.f32.mrf.mxu0  ;;  %v1662_v13 = vpop.f32.mrf.mxu1 }
 0x23f   :  { %v308_v14 = vadd.f32 %v2156_v6, %v303_v10  ;;  %v1511_v16 = vmul.f32 -1.442695, %v369_v11 }
 0x240   :  { %v305_v19 = vpop.f32.mrf.mxu0  ;;  %v365_v20 = vpop.f32.mrf.mxu1 }
 0x241   :  { %v1509_v21 = vmul.f32 -1.442695, %v308_v14  ;;  %1838 = vtanh.f32 %v308_v14 }
 0x242   :  { %1840 = vpow2.f32 %v1511_v16  ;;  %v1655_v22 = vpop.f32.mrf.mxu0  ;;  %v1663_v23 = vpop.f32.mrf.mxu1 }
 0x243   :  { %1842 = vpow2.f32 %v1509_v21 }
 0x244   :  { %1844 = vtanh.f32 %v369_v11 }
 0x24e   :  { %v1839_v24 = vpop.eup %1838 }
 0x24f   :  { %v1841_v25 = vpop.eup %1840  ;;  %318 = vrot.lane.b32.xlu0 %v1839_v24, %s1965_s4 }
 0x250   :  { %v1843_v26 = vpop.eup %1842  ;;  %v373_v27 = vadd.f32 1.0, %v1841_v25 }
 0x251   :  { %v312_v28 = vadd.f32 1.0, %v1843_v26  ;;  %v1845_v29 = vpop.eup %1844 }
 0x252   :  { %1846 = vrcp.f32 %v373_v27 }
 0x253   :  { %1848 = vrcp.f32 %v312_v28  ;;  %379 = vrot.lane.b32.xlu0 %v1845_v29, %s1965_s4 }
 0x25f   :  { %v1847_v30 = vpop.eup %1846 }
 0x260   :  { %v1849_v31 = vpop.eup %1848  ;;  %381 = vrot.lane.b32.xlu0 %v1847_v30, %s1963_s0 }
 0x261   :  { %316 = vrot.lane.b32.xlu1 %v1849_v31, %s1964_s20 }
 0x265   :  { %377 = vrot.lane.b32.xlu1 %v1847_v30, %s1964_s20 }
 0x269   :  { %320 = vrot.lane.b32.xlu1 %v1849_v31, %s1963_s0 }
 0x2c1   :  { %v319_v32 = vpop.permute.xlu0 %318 }
 0x2c2   :  { %v323_v34 = vmul.f32 %v1849_v31, %v319_v32 }
 0x2c5   :  { %v380_v37 = vpop.permute.xlu0 %379 }
 0x2c6   :  { %v384_v41 = vmul.f32 %v1847_v30, %v380_v37 }
 0x2d2   :  { %v382_v51 = vpop.permute.xlu0 %381 }
 0x2d3   :  { %v317_v33 = vpop.permute.xlu1 %316 }
 0x2d4   :  { %v322_v35 = vmul.f32 0.0, %v317_v33 }
 0x2d6   :  { %v2165_v38 = vadd.f32 %v323_v34, %v322_v35 }
 0x2d7   :  { %v378_v39 = vpop.permute.xlu1 %377 }
 0x2d8   :  { %1850 = vtanh.f32 %v2165_v38  ;;  %v383_v42 = vmul.f32 %v378_v39, %v2125_v53 }
 0x2da   :  { %v2169_v43 = vadd.f32 %v384_v41, %v383_v42 }
 0x2db   :  { %v321_v45 = vpop.permute.xlu1 %320 }
 0x2dc   :  { %1852 = vtanh.f32 %v2169_v43 }
 0x2e5   :  { %v1851_v44 = vpop.eup %1850 }
 0x2e6   :  { %v326_v48 = vmul.f32 %v1851_v44, %v321_v45 }
 0x2e8   :  { %v327_v49 = vpack.c.bf16 %v326_v48, %v326_v48 }
 0x2e9   :  { %v1853_v50 = vpop.eup %1852 }
 0x2ea   :  { %1669 = vmatmul.mubr.msk.bf16.vlgmr.msra.gmra.mxu0 %vm160_vm2, %v327_v49  ;;  %v387_v52 = vmul.f32 %v1853_v50, %v382_v51 }
 0x2eb   :  { %1681 = vmatpush3.bf16.msra.mxu0 %v2027_v8  ;;  %1684 = vmatprep.mubr.msk.bf16.mxu0 %vm1961_vm0, %v1960_v0 }
 0x2ec   :  { %v388_v54 = vpack.c.bf16 %v387_v52, %v387_v52  ;;  %1682 = vmatprep.subr.bf16.mxu0 %v1960_v0 }
 0x2ee   :  { %1677 = vmatmul.mubr.msk.bf16.vlgmr.msra.gmra.mxu1 %vm160_vm2, %v388_v54 }
 0x2ef   :  { %1683 = vmatpush3.bf16.msra.mxu0 %v2042_v15  ;;  %1689 = vmatpush3.bf16.msra.mxu1 %v2090_v40 }
 0x2f0   :  { %1696 = vmatprep.subr.bf16.mxu0 %v1960_v0  ;;  %1690 = vmatprep.subr.bf16.mxu1 %v1960_v0 }
 0x2f1   :  { %1692 = vmatprep.mubr.msk.bf16.mxu1 %vm1961_vm0, %v1960_v0 }
 0x2f2   :  { %1685 = vmatmul.mubr.msk.bf16.vlgmr.msra.gmra.mxu0 %vm160_vm2, %v388_v54 }
 0x2f3   :  { %1697 = vmatpush3.bf16.msra.mxu0 %v2078_v36  ;;  %1691 = vmatpush3.bf16.msra.mxu1 %v2108_v47 }
 0x2f4   :  { %1698 = vmatprep.subr.bf16.mxu0 %v1960_v0  ;;  %1704 = vmatprep.subr.bf16.mxu1 %v1960_v0 }
 0x2f5   :  { %1700 = vmatprep.mubr.msk.bf16.mxu0 %vm1961_vm0, %v1960_v0 }
 0x2f7   :  { %1699 = vmatpush3.bf16.msra.mxu0 %v2102_v46 }
 0x2f8   :  { %1712 = vmatprep.subr.bf16.mxu0 %v1960_v0 }
 0x3aa   :  { %v426_v53 = vpop.f32.mrf.mxu0 }
 0x3ac   :  { %v1670_v55 = vpop.f32.mrf.mxu0 }
 0x3ad   :  { %v133_v55 = vadd.f32 %v2142_v62, %v2057_v18 }
 0x3ae   :  { %v429_v56 = vpop.f32.mrf.mxu0  ;;  %v469_v57 = vpop.f32.mrf.mxu1 }
 0x3af   :  { %v470_v58 = vadd.f32 %v469_v57, %v426_v53 }
 0x3b0   :  { %v1671_v59 = vpop.f32.mrf.mxu0  ;;  %v1678_v60 = vpop.f32.mrf.mxu1 }
 0x3b1   :  { %v475_v63 = vadd.f32 %v2156_v6, %v470_v58 }
 0x3b2   :  { %v472_v5 = vpop.f32.mrf.mxu1  ;;  %v529_v7 = vpop.f32.mrf.mxu0 }
 0x3b3   :  { %v1514_v9 = vmul.f32 -1.442695, %v475_v63  ;;  %1854 = vtanh.f32 %v475_v63  ;;  %v536_v10 = vadd.f32 %v529_v7, %v130_v61 }
 0x3b4   :  { %v1679_v11 = vpop.f32.mrf.mxu1  ;;  %v1686_v12 = vpop.f32.mrf.mxu0 }
 0x3b5   :  { %1856 = vpow2.f32 %v1514_v9  ;;  %v1516_v13 = vmul.f32 -1.442695, %v536_v10 }
 0x3b6   :  { %1858 = vtanh.f32 %v536_v10  ;;  %v532_v14 = vpop.f32.mrf.mxu0 }
 0x3b7   :  { %1860 = vpow2.f32 %v1516_v13 }
 0x3b8   :  { %v1687_v16 = vpop.f32.mrf.mxu0 }
 0x3c0   :  { %v1855_v19 = vpop.eup %1854 }
 0x3c1   :  { %485 = vrot.lane.b32.xlu0 %v1855_v19, %s1965_s4 }
 0x3c2   :  { %v1857_v20 = vpop.eup %1856 }
 0x3c3   :  { %v1859_v17 = vpop.eup %1858  ;;  %v479_v21 = vadd.f32 1.0, %v1857_v20 }
 0x3c4   :  { %v1861_v22 = vpop.eup %1860 }
 0x3c5   :  { %1862 = vrcp.f32 %v479_v21  ;;  %v540_v23 = vadd.f32 1.0, %v1861_v22  ;;  %546 = vrot.lane.b32.xlu0 %v1859_v17, %s1965_s4 }
 0x3c7   :  { %1864 = vrcp.f32 %v540_v23 }
 0x3d2   :  { %v1863_v24 = vpop.eup %1862 }
 0x3d3   :  { %483 = vrot.lane.b32.xlu1 %v1863_v24, %s1964_s20 }
 0x3d4   :  { %v1865_v25 = vpop.eup %1864 }
 0x3d5   :  { %548 = vrot.lane.b32.xlu0 %v1865_v25, %s1963_s0 }
 0x3d7   :  { %544 = vrot.lane.b32.xlu1 %v1865_v25, %s1964_s20 }
 0x3db   :  { %487 = vrot.lane.b32.xlu1 %v1863_v24, %s1963_s0 }
 0x433   :  { %v486_v26 = vpop.permute.xlu0 %485 }
 0x434   :  { %v490_v28 = vmul.f32 %v1863_v24, %v486_v26 }
 0x437   :  { %v547_v30 = vpop.permute.xlu0 %546 }
 0x438   :  { %v551_v33 = vmul.f32 %v1865_v25, %v547_v30 }
 0x445   :  { %v484_v27 = vpop.permute.xlu1 %483 }
 0x446   :  { %v489_v29 = vmul.f32 %v484_v27, %v2165_v38 }
 0x447   :  { %v549_v45 = vpop.permute.xlu0 %548 }
 0x448   :  { %v2203_v31 = vadd.f32 %v490_v28, %v489_v29 }
 0x449   :  { %v545_v32 = vpop.permute.xlu1 %544 }
 0x44a   :  { %1866 = vtanh.f32 %v2203_v31  ;;  %v550_v34 = vmul.f32 %v545_v32, %v2169_v43 }
 0x44c   :  { %v2207_v35 = vadd.f32 %v551_v33, %v550_v34 }
 0x44d   :  { %v488_v39 = vpop.permute.xlu1 %487 }
 0x44e   :  { %1868 = vtanh.f32 %v2207_v35 }
 0x457   :  { %v1867_v37 = vpop.eup %1866 }
 0x458   :  { %v493_v41 = vmul.f32 %v1867_v37, %v488_v39 }
 0x45a   :  { %v494_v42 = vpack.c.bf16 %v493_v41, %v493_v41 }
 0x45b   :  { %v1869_v44 = vpop.eup %1868 }
 0x45c   :  { %1693 = vmatmul.mubr.msk.bf16.vlgmr.msra.gmra.mxu1 %vm160_vm2, %v494_v42  ;;  %v554_v38 = vmul.f32 %v1869_v44, %v549_v45 }
 0x45d   :  { %1705 = vmatpush3.bf16.msra.mxu1 %v2027_v8  ;;  %1708 = vmatprep.mubr.msk.bf16.mxu1 %vm1961_vm0, %v1960_v0 }
 0x45e   :  { %v555_v48 = vpack.c.bf16 %v554_v38, %v554_v38  ;;  %1706 = vmatprep.subr.bf16.mxu1 %v1960_v0 }
 0x460   :  { %1701 = vmatmul.mubr.msk.bf16.vlgmr.msra.gmra.mxu0 %vm160_vm2, %v555_v48 }
 0x461   :  { %1707 = vmatpush3.bf16.msra.mxu1 %v2042_v15  ;;  %1713 = vmatpush3.bf16.msra.mxu0 %v2090_v40 }
 0x462   :  { %1720 = vmatprep.subr.bf16.mxu1 %v1960_v0  ;;  %1714 = vmatprep.subr.bf16.mxu0 %v1960_v0 }
 0x463   :  { %1716 = vmatprep.mubr.msk.bf16.mxu0 %vm1961_vm0, %v1960_v0 }
 0x464   :  { %1709 = vmatmul.mubr.msk.bf16.vlgmr.msra.gmra.mxu1 %vm160_vm2, %v555_v48 }
 0x465   :  { %1721 = vmatpush3.bf16.msra.mxu1 %v2078_v36  ;;  %1715 = vmatpush3.bf16.msra.mxu0 %v2108_v47 }
 0x466   :  { %1722 = vmatprep.subr.bf16.mxu1 %v1960_v0  ;;  %1728 = vmatprep.subr.bf16.mxu0 %v1960_v0 }
 0x467   :  { %1724 = vmatprep.mubr.msk.bf16.mxu1 %vm1961_vm0, %v1960_v0 }
 0x469   :  { %1723 = vmatpush3.bf16.msra.mxu1 %v2102_v46 }
 0x46a   :  { %1736 = vmatprep.subr.bf16.mxu1 %v1960_v0 }
 0x51c   :  { %v593_v43 = vpop.f32.mrf.mxu1 }
 0x51e   :  { %v1694_v49 = vpop.f32.mrf.mxu1 }
 0x520   :  { %v596_v50 = vpop.f32.mrf.mxu1  ;;  %v636_v51 = vpop.f32.mrf.mxu0 }
 0x521   :  { %v637_v52 = vadd.f32 %v636_v51, %v593_v43  ;;  %v138_v43 = vadd.f32 %v2057_v18, %v2146_v2 }
 0x522   :  { %v1695_v54 = vpop.f32.mrf.mxu1  ;;  %v1702_v53 = vpop.f32.mrf.mxu0 }
 0x523   :  { %v642_v56 = vadd.f32 %v2156_v6, %v637_v52 }
 0x524   :  { %v639_v57 = vpop.f32.mrf.mxu0  ;;  %v696_v58 = vpop.f32.mrf.mxu1 }
 0x525   :  { %v1519_v59 = vmul.f32 -1.442695, %v642_v56  ;;  %1870 = vtanh.f32 %v642_v56  ;;  %v703_v60 = vadd.f32 %v696_v58, %v133_v55 }
 0x526   :  { %v1703_v61 = vpop.f32.mrf.mxu0  ;;  %v1710_v63 = vpop.f32.mrf.mxu1 }
 0x527   :  { %1872 = vpow2.f32 %v1519_v59  ;;  %v1521_v5 = vmul.f32 -1.442695, %v703_v60 }
 0x528   :  { %1874 = vtanh.f32 %v703_v60  ;;  %v699_v7 = vpop.f32.mrf.mxu1 }
 0x529   :  { %1876 = vpow2.f32 %v1521_v5 }
 0x52a   :  { %v1711_v9 = vpop.f32.mrf.mxu1 }
 0x532   :  { %v1871_v10 = vpop.eup %1870 }
 0x533   :  { %652 = vrot.lane.b32.xlu0 %v1871_v10, %s1965_s4 }
 0x534   :  { %v1873_v11 = vpop.eup %1872 }
 0x535   :  { %v1875_v62 = vpop.eup %1874  ;;  %v646_v12 = vadd.f32 1.0, %v1873_v11 }
 0x536   :  { %v1877_v13 = vpop.eup %1876 }
 0x537   :  { %1878 = vrcp.f32 %v646_v12  ;;  %v707_v14 = vadd.f32 1.0, %v1877_v13  ;;  %713 = vrot.lane.b32.xlu0 %v1875_v62, %s1965_s4 }
 0x539   :  { %1880 = vrcp.f32 %v707_v14 }
 0x544   :  { %v1879_v16 = vpop.eup %1878 }
 0x545   :  { %650 = vrot.lane.b32.xlu1 %v1879_v16, %s1964_s20 }
 0x546   :  { %v1881_v19 = vpop.eup %1880 }
 0x547   :  { %715 = vrot.lane.b32.xlu0 %v1881_v19, %s1963_s0 }
 0x549   :  { %711 = vrot.lane.b32.xlu1 %v1881_v19, %s1964_s20 }
 0x54d   :  { %654 = vrot.lane.b32.xlu1 %v1879_v16, %s1963_s0 }
 0x5a5   :  { %v653_v20 = vpop.permute.xlu0 %652 }
 0x5a6   :  { %v657_v21 = vmul.f32 %v1879_v16, %v653_v20 }
 0x5a9   :  { %v714_v23 = vpop.permute.xlu0 %713 }
 0x5aa   :  { %v718_v26 = vmul.f32 %v1881_v19, %v714_v23 }
 0x5b7   :  { %v651_v17 = vpop.permute.xlu1 %650 }
 0x5b8   :  { %v656_v22 = vmul.f32 %v651_v17, %v2203_v31 }
 0x5b9   :  { %v716_v37 = vpop.permute.xlu0 %715 }
 0x5ba   :  { %v2241_v24 = vadd.f32 %v657_v21, %v656_v22 }
 0x5bb   :  { %v712_v25 = vpop.permute.xlu1 %711 }
 0x5bc   :  { %1882 = vtanh.f32 %v2241_v24  ;;  %v717_v27 = vmul.f32 %v712_v25, %v2207_v35 }
 0x5be   :  { %v2245_v28 = vadd.f32 %v718_v26, %v717_v27 }
 0x5bf   :  { %v655_v30 = vpop.permute.xlu1 %654 }
 0x5c0   :  { %1884 = vtanh.f32 %v2245_v28 }
 0x5c9   :  { %v1883_v29 = vpop.eup %1882 }
 0x5ca   :  { %v660_v32 = vmul.f32 %v1883_v29, %v655_v30 }
 0x5cc   :  { %v661_v33 = vpack.c.bf16 %v660_v32, %v660_v32 }
 0x5cd   :  { %v1885_v34 = vpop.eup %1884 }
 0x5ce   :  { %1717 = vmatmul.mubr.msk.bf16.vlgmr.msra.gmra.mxu0 %vm160_vm2, %v661_v33  ;;  %v721_v31 = vmul.f32 %v1885_v34, %v716_v37 }
 0x5cf   :  { %1729 = vmatpush3.bf16.msra.mxu0 %v2027_v8  ;;  %1732 = vmatprep.mubr.msk.bf16.mxu0 %vm1961_vm0, %v1960_v0 }
 0x5d0   :  { %v722_v39 = vpack.c.bf16 %v721_v31, %v721_v31  ;;  %1730 = vmatprep.subr.bf16.mxu0 %v1960_v0 }
 0x5d2   :  { %1725 = vmatmul.mubr.msk.bf16.vlgmr.msra.gmra.mxu1 %vm160_vm2, %v722_v39 }
 0x5d3   :  { %1731 = vmatpush3.bf16.msra.mxu0 %v2042_v15  ;;  %1737 = vmatpush3.bf16.msra.mxu1 %v2090_v40 }
 0x5d4   :  { %1744 = vmatprep.subr.bf16.mxu0 %v1960_v0  ;;  %1738 = vmatprep.subr.bf16.mxu1 %v1960_v0 }
 0x5d5   :  { %1740 = vmatprep.mubr.msk.bf16.mxu1 %vm1961_vm0, %v1960_v0 }
 0x5d6   :  { %1733 = vmatmul.mubr.msk.bf16.vlgmr.msra.gmra.mxu0 %vm160_vm2, %v722_v39  ;;  %v141_v39 = vadd.f32 %v2057_v18, %v2150_v4 }
 0x5d7   :  { %1745 = vmatpush3.bf16.msra.mxu0 %v2078_v36  ;;  %1739 = vmatpush3.bf16.msra.mxu1 %v2108_v47 }
 0x5d8   :  { %1746 = vmatprep.subr.bf16.mxu0 %v1960_v0  ;;  %1752 = vmatprep.subr.bf16.mxu1 %v1960_v0 }
 0x5d9   :  { %1748 = vmatprep.mubr.msk.bf16.mxu0 %vm1961_vm0, %v1960_v0 }
 0x5db   :  { %1747 = vmatpush3.bf16.msra.mxu0 %v2102_v46 }
 0x5dc   :  { %1760 = vmatprep.subr.bf16.mxu0 %v1960_v0 }
 0x68e   :  { %v760_v35 = vpop.f32.mrf.mxu0 }
 0x690   :  { %v1718_v41 = vpop.f32.mrf.mxu0 }
 0x692   :  { %v763_v42 = vpop.f32.mrf.mxu0  ;;  %v803_v44 = vpop.f32.mrf.mxu1 }
 0x693   :  { %v804_v45 = vadd.f32 %v803_v44, %v760_v35 }
 0x694   :  { %v1719_v38 = vpop.f32.mrf.mxu0  ;;  %v1726_v48 = vpop.f32.mrf.mxu1 }
 0x695   :  { %v809_v49 = vadd.f32 %v2156_v6, %v804_v45 }
 0x696   :  { %v806_v50 = vpop.f32.mrf.mxu1  ;;  %v863_v51 = vpop.f32.mrf.mxu0 }
 0x697   :  { %v1524_v52 = vmul.f32 -1.442695, %v809_v49  ;;  %1886 = vtanh.f32 %v809_v49  ;;  %v870_v54 = vadd.f32 %v863_v51, %v138_v43 }
 0x698   :  { %v1727_v53 = vpop.f32.mrf.mxu1  ;;  %v1734_v55 = vpop.f32.mrf.mxu0 }
 0x699   :  { %1888 = vpow2.f32 %v1524_v52  ;;  %v1526_v56 = vmul.f32 -1.442695, %v870_v54 }
 0x69a   :  { %1890 = vtanh.f32 %v870_v54  ;;  %v866_v57 = vpop.f32.mrf.mxu0 }
 0x69b   :  { %1892 = vpow2.f32 %v1526_v56 }
 0x69c   :  { %v1735_v58 = vpop.f32.mrf.mxu0 }
 0x6a4   :  { %v1887_v59 = vpop.eup %1886 }
 0x6a5   :  { %819 = vrot.lane.b32.xlu0 %v1887_v59, %s1965_s4 }
 0x6a6   :  { %v1889_v60 = vpop.eup %1888 }
 0x6a7   :  { %v1891_v2 = vpop.eup %1890  ;;  %v813_v61 = vadd.f32 1.0, %v1889_v60 }
 0x6a8   :  { %v1893_v63 = vpop.eup %1892 }
 0x6a9   :  { %1894 = vrcp.f32 %v813_v61  ;;  %v874_v5 = vadd.f32 1.0, %v1893_v63  ;;  %880 = vrot.lane.b32.xlu0 %v1891_v2, %s1965_s4 }
 0x6ab   :  { %1896 = vrcp.f32 %v874_v5 }
 0x6b6   :  { %v1895_v7 = vpop.eup %1894 }
 0x6b7   :  { %817 = vrot.lane.b32.xlu1 %v1895_v7, %s1964_s20 }
 0x6b8   :  { %v1897_v9 = vpop.eup %1896 }
 0x6b9   :  { %882 = vrot.lane.b32.xlu0 %v1897_v9, %s1963_s0 }
 0x6bb   :  { %878 = vrot.lane.b32.xlu1 %v1897_v9, %s1964_s20 }
 0x6bf   :  { %821 = vrot.lane.b32.xlu1 %v1895_v7, %s1963_s0 }
 0x717   :  { %v820_v10 = vpop.permute.xlu0 %819 }
 0x718   :  { %v824_v62 = vmul.f32 %v1895_v7, %v820_v10 }
 0x71b   :  { %v881_v13 = vpop.permute.xlu0 %880 }
 0x71c   :  { %v885_v19 = vmul.f32 %v1897_v9, %v881_v13 }
 0x729   :  { %v818_v11 = vpop.permute.xlu1 %817 }
 0x72a   :  { %v823_v12 = vmul.f32 %v818_v11, %v2241_v24 }
 0x72b   :  { %v883_v27 = vpop.permute.xlu0 %882 }
 0x72c   :  { %v2279_v14 = vadd.f32 %v824_v62, %v823_v12 }
 0x72d   :  { %v879_v16 = vpop.permute.xlu1 %878 }
 0x72e   :  { %1898 = vtanh.f32 %v2279_v14  ;;  %v884_v20 = vmul.f32 %v879_v16, %v2245_v28 }
 0x730   :  { %v2283_v17 = vadd.f32 %v885_v19, %v884_v20 }
 0x731   :  { %v822_v22 = vpop.permute.xlu1 %821 }
 0x732   :  { %1900 = vtanh.f32 %v2283_v17 }
 0x73b   :  { %v1899_v21 = vpop.eup %1898 }
 0x73c   :  { %v827_v23 = vmul.f32 %v1899_v21, %v822_v22 }
 0x73e   :  { %v828_v25 = vpack.c.bf16 %v827_v23, %v827_v23 }
 0x73f   :  { %v1901_v26 = vpop.eup %1900 }
 0x740   :  { %1741 = vmatmul.mubr.msk.bf16.vlgmr.msra.gmra.mxu1 %vm160_vm2, %v828_v25  ;;  %v888_v24 = vmul.f32 %v1901_v26, %v883_v27 }
 0x741   :  { %1753 = vmatpush3.bf16.msra.mxu1 %v2027_v8  ;;  %1756 = vmatprep.mubr.msk.bf16.mxu1 %vm1961_vm0, %v1960_v0 }
 0x742   :  { %v889_v29 = vpack.c.bf16 %v888_v24, %v888_v24  ;;  %1754 = vmatprep.subr.bf16.mxu1 %v1960_v0  ;;  %v146_v24 = vadd.f32 %v2144_v1, %v2057_v18 }
 0x744   :  { %1749 = vmatmul.mubr.msk.bf16.vlgmr.msra.gmra.mxu0 %vm160_vm2, %v889_v29 }
 0x745   :  { %1755 = vmatpush3.bf16.msra.mxu1 %v2042_v15  ;;  %1761 = vmatpush3.bf16.msra.mxu0 %v2090_v40 }
 0x746   :  { %1768 = vmatprep.subr.bf16.mxu1 %v1960_v0  ;;  %1762 = vmatprep.subr.bf16.mxu0 %v1960_v0 }
 0x747   :  { %1764 = vmatprep.mubr.msk.bf16.mxu0 %vm1961_vm0, %v1960_v0 }
 0x748   :  { %1757 = vmatmul.mubr.msk.bf16.vlgmr.msra.gmra.mxu1 %vm160_vm2, %v889_v29 }
 0x749   :  { %1769 = vmatpush3.bf16.msra.mxu1 %v2078_v36  ;;  %1763 = vmatpush3.bf16.msra.mxu0 %v2108_v47 }
 0x74a   :  { %1770 = vmatprep.subr.bf16.mxu1 %v1960_v0  ;;  %1776 = vmatprep.subr.bf16.mxu0 %v1960_v0 }
 0x74b   :  { %1772 = vmatprep.mubr.msk.bf16.mxu1 %vm1961_vm0, %v1960_v0 }
 0x74d   :  { %1771 = vmatpush3.bf16.msra.mxu1 %v2102_v46 }
 0x74e   :  { %1784 = vmatprep.subr.bf16.mxu1 %v1960_v0 }
 0x800   :  { %v927_v28 = vpop.f32.mrf.mxu1 }
 0x802   :  { %v1742_v30 = vpop.f32.mrf.mxu1 }
 0x804   :  { %v930_v32 = vpop.f32.mrf.mxu1  ;;  %v970_v33 = vpop.f32.mrf.mxu0 }
 0x805   :  { %v971_v34 = vadd.f32 %v970_v33, %v927_v28 }
 0x806   :  { %v1743_v37 = vpop.f32.mrf.mxu1  ;;  %v1750_v31 = vpop.f32.mrf.mxu0 }
 0x807   :  { %v976_v35 = vadd.f32 %v2156_v6, %v971_v34 }
 0x808   :  { %v973_v41 = vpop.f32.mrf.mxu0  ;;  %v1030_v42 = vpop.f32.mrf.mxu1 }
 0x809   :  { %v1529_v44 = vmul.f32 -1.442695, %v976_v35  ;;  %1902 = vtanh.f32 %v976_v35  ;;  %v1037_v45 = vadd.f32 %v1030_v42, %v141_v39 }
 0x80a   :  { %v1751_v38 = vpop.f32.mrf.mxu0  ;;  %v1758_v48 = vpop.f32.mrf.mxu1 }
 0x80b   :  { %1904 = vpow2.f32 %v1529_v44  ;;  %v1531_v43 = vmul.f32 -1.442695, %v1037_v45 }
 0x80c   :  { %1906 = vtanh.f32 %v1037_v45  ;;  %v1033_v49 = vpop.f32.mrf.mxu1 }
 0x80d   :  { %1908 = vpow2.f32 %v1531_v43 }
 0x80e   :  { %v1759_v50 = vpop.f32.mrf.mxu1 }
 0x816   :  { %v1903_v51 = vpop.eup %1902 }
 0x817   :  { %986 = vrot.lane.b32.xlu0 %v1903_v51, %s1965_s4 }
 0x818   :  { %v1905_v52 = vpop.eup %1904 }
 0x819   :  { %v1907_v4 = vpop.eup %1906  ;;  %v980_v54 = vadd.f32 1.0, %v1905_v52 }
 0x81a   :  { %v1909_v53 = vpop.eup %1908 }
 0x81b   :  { %1910 = vrcp.f32 %v980_v54  ;;  %v1041_v55 = vadd.f32 1.0, %v1909_v53  ;;  %1047 = vrot.lane.b32.xlu0 %v1907_v4, %s1965_s4 }
 0x81d   :  { %1912 = vrcp.f32 %v1041_v55 }
 0x828   :  { %v1911_v56 = vpop.eup %1910 }
 0x829   :  { %984 = vrot.lane.b32.xlu1 %v1911_v56, %s1964_s20 }
 0x82a   :  { %v1913_v57 = vpop.eup %1912 }
 0x82b   :  { %1049 = vrot.lane.b32.xlu0 %v1913_v57, %s1963_s0 }
 0x82d   :  { %1045 = vrot.lane.b32.xlu1 %v1913_v57, %s1964_s20 }
 0x831   :  { %988 = vrot.lane.b32.xlu1 %v1911_v56, %s1963_s0 }
 0x889   :  { %v987_v58 = vpop.permute.xlu0 %986 }
 0x88a   :  { %v991_v60 = vmul.f32 %v1911_v56, %v987_v58 }
 0x88d   :  { %v1048_v61 = vpop.permute.xlu0 %1047 }
 0x88e   :  { %v1052_v7 = vmul.f32 %v1913_v57, %v1048_v61 }
 0x89b   :  { %v985_v59 = vpop.permute.xlu1 %984 }
 0x89c   :  { %v990_v2 = vmul.f32 %v985_v59, %v2279_v14 }
 0x89d   :  { %v1050_v19 = vpop.permute.xlu0 %1049 }
 0x89e   :  { %v2317_v63 = vadd.f32 %v991_v60, %v990_v2 }
 0x89f   :  { %v1046_v5 = vpop.permute.xlu1 %1045 }
 0x8a0   :  { %1914 = vtanh.f32 %v2317_v63  ;;  %v1051_v9 = vmul.f32 %v1046_v5, %v2283_v17 }
 0x8a2   :  { %v2321_v10 = vadd.f32 %v1052_v7, %v1051_v9 }
 0x8a3   :  { %v989_v62 = vpop.permute.xlu1 %988 }
 0x8a4   :  { %1916 = vtanh.f32 %v2321_v10 }
 0x8ad   :  { %v1915_v11 = vpop.eup %1914 }
 0x8ae   :  { %v994_v12 = vmul.f32 %v1915_v11, %v989_v62 }
 0x8b0   :  { %v995_v13 = vpack.c.bf16 %v994_v12, %v994_v12 }
 0x8b1   :  { %v1917_v16 = vpop.eup %1916 }
 0x8b2   :  { %1765 = vmatmul.mubr.msk.bf16.vlgmr.msra.gmra.mxu0 %vm160_vm2, %v995_v13  ;;  %v1055_v14 = vmul.f32 %v1917_v16, %v1050_v19 }
 0x8b3   :  { %1777 = vmatpush3.bf16.msra.mxu0 %v2027_v8  ;;  %1780 = vmatprep.mubr.msk.bf16.mxu0 %vm1961_vm0, %v1960_v0 }
 0x8b4   :  { %v1056_v20 = vpack.c.bf16 %v1055_v14, %v1055_v14  ;;  %1778 = vmatprep.subr.bf16.mxu0 %v1960_v0 }
 0x8b6   :  { %1773 = vmatmul.mubr.msk.bf16.vlgmr.msra.gmra.mxu1 %vm160_vm2, %v1056_v20 }
 0x8b7   :  { %1779 = vmatpush3.bf16.msra.mxu0 %v2042_v15  ;;  %1785 = vmatpush3.bf16.msra.mxu1 %v2090_v40 }
 0x8b8   :  { %1792 = vmatprep.subr.bf16.mxu0 %v1960_v0  ;;  %1786 = vmatprep.subr.bf16.mxu1 %v1960_v0 }
 0x8b9   :  { %1788 = vmatprep.mubr.msk.bf16.mxu1 %vm1961_vm0, %v1960_v0 }
 0x8ba   :  { %1781 = vmatmul.mubr.msk.bf16.vlgmr.msra.gmra.mxu0 %vm160_vm2, %v1056_v20 }
 0x8bb   :  { %1793 = vmatpush3.bf16.msra.mxu0 %v2078_v36  ;;  %1787 = vmatpush3.bf16.msra.mxu1 %v2108_v47 }
 0x8bc   :  { %1794 = vmatprep.subr.bf16.mxu0 %v1960_v0  ;;  %1800 = vmatprep.subr.bf16.mxu1 %v1960_v0 }
 0x8bd   :  { %1796 = vmatprep.mubr.msk.bf16.mxu0 %vm1961_vm0, %v1960_v0 }
 0x8bf   :  { %1795 = vmatpush3.bf16.msra.mxu0 %v2102_v46 }
 0x8c0   :  { %1808 = vmatprep.subr.bf16.mxu0 %v1960_v0 }
 0x972   :  { %v1094_v17 = vpop.f32.mrf.mxu0 }
 0x974   :  { %v1766_v21 = vpop.f32.mrf.mxu0 }
 0x976   :  { %v1097_v22 = vpop.f32.mrf.mxu0  ;;  %v1137_v23 = vpop.f32.mrf.mxu1 }
 0x977   :  { %v1138_v25 = vadd.f32 %v1137_v23, %v1094_v17 }
 0x978   :  { %v1767_v26 = vpop.f32.mrf.mxu0  ;;  %v1774_v27 = vpop.f32.mrf.mxu1 }
 0x979   :  { %v1143_v29 = vadd.f32 %v2156_v6, %v1138_v25 }
 0x97a   :  { %v1140_v28 = vpop.f32.mrf.mxu1  ;;  %v1197_v30 = vpop.f32.mrf.mxu0 }
 0x97b   :  { %v1534_v32 = vmul.f32 -1.442695, %v1143_v29  ;;  %1918 = vtanh.f32 %v1143_v29  ;;  %v1204_v33 = vadd.f32 %v1197_v30, %v146_v24 }
 0x97c   :  { %v1775_v34 = vpop.f32.mrf.mxu1  ;;  %v1782_v37 = vpop.f32.mrf.mxu0 }
 0x97d   :  { %1920 = vpow2.f32 %v1534_v32  ;;  %v1536_v31 = vmul.f32 -1.442695, %v1204_v33 }
 0x97e   :  { %1922 = vtanh.f32 %v1204_v33  ;;  %v1200_v39 = vpop.f32.mrf.mxu0 }
 0x97f   :  { %1924 = vpow2.f32 %v1536_v31 }
 0x980   :  { %v1783_v35 = vpop.f32.mrf.mxu0 }
 0x988   :  { %v1919_v41 = vpop.eup %1918 }
 0x989   :  { %1153 = vrot.lane.b32.xlu0 %v1919_v41, %s1965_s4 }
 0x98a   :  { %v1921_v42 = vpop.eup %1920 }
 0x98b   :  { %v1923_v18 = vpop.eup %1922  ;;  %v1147_v1 = vadd.f32 1.0, %v1921_v42 }
 0x98c   :  { %v1925_v44 = vpop.eup %1924 }
 0x98d   :  { %1926 = vrcp.f32 %v1147_v1  ;;  %v1208_v45 = vadd.f32 1.0, %v1925_v44  ;;  %1214 = vrot.lane.b32.xlu0 %v1923_v18, %s1965_s4 }
 0x98f   :  { %1928 = vrcp.f32 %v1208_v45 }
 0x99a   :  { %v1927_v38 = vpop.eup %1926 }
 0x99b   :  { %1151 = vrot.lane.b32.xlu1 %v1927_v38, %s1964_s20 }
 0x99c   :  { %v1929_v48 = vpop.eup %1928 }
 0x99d   :  { %1216 = vrot.lane.b32.xlu0 %v1929_v48, %s1963_s0 }
 0x99f   :  { %1212 = vrot.lane.b32.xlu1 %v1929_v48, %s1964_s20 }
 0x9a3   :  { %1155 = vrot.lane.b32.xlu1 %v1927_v38, %s1963_s0 }
 0x9fb   :  { %v1154_v43 = vpop.permute.xlu0 %1153 }
 0x9fc   :  { %v1158_v50 = vmul.f32 %v1927_v38, %v1154_v43 }
 0x9ff   :  { %v1215_v52 = vpop.permute.xlu0 %1214 }
 0xa00   :  { %v1219_v53 = vmul.f32 %v1929_v48, %v1215_v52 }
 0xa0d   :  { %v1152_v49 = vpop.permute.xlu1 %1151 }
 0xa0e   :  { %v1157_v51 = vmul.f32 %v1152_v49, %v2317_v63 }
 0xa0f   :  { %v1217_v61 = vpop.permute.xlu0 %1216 }
 0xa10   :  { %v2355_v4 = vadd.f32 %v1158_v50, %v1157_v51 }
 0xa11   :  { %v1213_v54 = vpop.permute.xlu1 %1212 }
 0xa12   :  { %1930 = vtanh.f32 %v2355_v4  ;;  %v1218_v55 = vmul.f32 %v1213_v54, %v2321_v10  ;;  %v1959_v54 = vld [vmem:[%s2412_s6] ss:$0 sm:$0xff] }
 0xa14   :  { %v2359_v56 = vadd.f32 %v1219_v53, %v1218_v55 }
 0xa15   :  { %v1156_v58 = vpop.permute.xlu1 %1155 }
 0xa16   :  { %1932 = vtanh.f32 %v2359_v56 }
 0xa1f   :  { %v1931_v57 = vpop.eup %1930 }
 0xa20   :  { %v1161_v59 = vmul.f32 %v1931_v57, %v1156_v58 }
 0xa22   :  { %v1162_v60 = vpack.c.bf16 %v1161_v59, %v1161_v59 }
 0xa23   :  { %v1933_v2 = vpop.eup %1932 }
 0xa24   :  { %1789 = vmatmul.mubr.msk.bf16.vlgmr.msra.gmra.mxu1 %vm160_vm2, %v1162_v60  ;;  %v1222_v63 = vmul.f32 %v1933_v2, %v1217_v61 }
 0xa25   :  { %1801 = vmatpush3.bf16.msra.mxu1 %v2027_v8  ;;  %1804 = vmatprep.mubr.msk.bf16.mxu1 %vm1961_vm0, %v1960_v0 }
 0xa26   :  { %v1223_v5 = vpack.c.bf16 %v1222_v63, %v1222_v63  ;;  %1802 = vmatprep.subr.bf16.mxu1 %v1960_v0 }
 0xa28   :  { %1797 = vmatmul.mubr.msk.bf16.vlgmr.msra.gmra.mxu0 %vm160_vm2, %v1223_v5 }
 0xa29   :  { %1803 = vmatpush3.bf16.msra.mxu1 %v2042_v15  ;;  %1809 = vmatpush3.bf16.msra.mxu0 %v2090_v40 }
 0xa2a   :  { %1816 = vmatprep.subr.bf16.mxu1 %v1960_v0  ;;  %1810 = vmatprep.subr.bf16.mxu0 %v1960_v0 }
 0xa2b   :  { %1812 = vmatprep.mubr.msk.bf16.mxu0 %vm1961_vm0, %v1960_v0 }
 0xa2c   :  { %1805 = vmatmul.mubr.msk.bf16.vlgmr.msra.gmra.mxu1 %vm160_vm2, %v1223_v5 }
 0xa2d   :  { %1817 = vmatpush3.bf16.msra.mxu1 %v2078_v36  ;;  %1811 = vmatpush3.bf16.msra.mxu0 %v2108_v47  ;;  %v1958_v36 = vld [vmem:[%s2409_s3] ss:$0 sm:$0xff] }
 0xa2e   :  { %1818 = vmatprep.subr.bf16.mxu1 %v1960_v0  ;;  %1820 = vmatprep.mubr.msk.bf16.mxu1 %vm1961_vm0, %v1960_v0  ;;  %v149_v47 = vadd.f32 %v1958_v36, %v2148_v3 }
 0xa31   :  { %1819 = vmatpush3.bf16.msra.mxu1 %v2102_v46 }
 0xae4   :  { %v1261_v8 = vpop.f32.mrf.mxu1 }
 0xae6   :  { %v1790_v15 = vpop.f32.mrf.mxu1 }
 0xae8   :  { %v1264_v40 = vpop.f32.mrf.mxu1  ;;  %v1304_v7 = vpop.f32.mrf.mxu0 }
 0xae9   :  { %v1305_v9 = vadd.f32 %v1304_v7, %v1261_v8 }
 0xaea   :  { %v1791_v10 = vpop.f32.mrf.mxu1  ;;  %v1798_v11 = vpop.f32.mrf.mxu0 }
 0xaeb   :  { %v1310_v62 = vadd.f32 %v2156_v6, %v1305_v9 }
 0xaec   :  { %v1307_v12 = vpop.f32.mrf.mxu0  ;;  %v1364_v13 = vpop.f32.mrf.mxu1 }
 0xaed   :  { %v1539_v0 = vmul.f32 -1.442695, %v1310_v62  ;;  %1934 = vtanh.f32 %v1310_v62  ;;  %v1371_v46 = vadd.f32 %v1364_v13, %v149_v47 }
 0xaee   :  { %v1799_v16 = vpop.f32.mrf.mxu0  ;;  %v1806_v19 = vpop.f32.mrf.mxu1 }
 0xaef   :  { %1936 = vpow2.f32 %v1539_v0  ;;  %v1541_v14 = vmul.f32 -1.442695, %v1371_v46 }
 0xaf0   :  { %1938 = vtanh.f32 %v1371_v46  ;;  %v1367_v20 = vpop.f32.mrf.mxu1 }
 0xaf1   :  { %1940 = vpow2.f32 %v1541_v14 }
 0xaf2   :  { %v1807_v17 = vpop.f32.mrf.mxu1 }
 0xafa   :  { %v1935_v21 = vpop.eup %1934 }
 0xafb   :  { %1320 = vrot.lane.b32.xlu0 %v1935_v21, %s1965_s4 }
 0xafc   :  { %v1937_v22 = vpop.eup %1936 }
 0xafd   :  { %v1939_v3 = vpop.eup %1938  ;;  %v1314_v23 = vadd.f32 1.0, %v1937_v22 }
 0xafe   :  { %v1941_v6 = vpop.eup %1940 }
 0xaff   :  { %1942 = vrcp.f32 %v1314_v23  ;;  %v1375_v25 = vadd.f32 1.0, %v1941_v6  ;;  %1381 = vrot.lane.b32.xlu0 %v1939_v3, %s1965_s4 }
 0xb01   :  { %1944 = vrcp.f32 %v1375_v25 }
 0xb0c   :  { %v1943_v26 = vpop.eup %1942 }
 0xb0d   :  { %1318 = vrot.lane.b32.xlu1 %v1943_v26, %s1964_s20 }
 0xb0e   :  { %v1945_v27 = vpop.eup %1944 }
 0xb0f   :  { %1383 = vrot.lane.b32.xlu0 %v1945_v27, %s1963_s0 }
 0xb11   :  { %1379 = vrot.lane.b32.xlu1 %v1945_v27, %s1964_s20 }
 0xb15   :  { %1322 = vrot.lane.b32.xlu1 %v1943_v26, %s1963_s0 }
 0xb6d   :  { %v1321_v24 = vpop.permute.xlu0 %1320 }
 0xb6e   :  { %v1325_v28 = vmul.f32 %v1943_v26, %v1321_v24 }
 0xb71   :  { %v1382_v32 = vpop.permute.xlu0 %1381 }
 0xb72   :  { %v1386_v37 = vmul.f32 %v1945_v27, %v1382_v32 }
 0xb7f   :  { %v1319_v29 = vpop.permute.xlu1 %1318 }
 0xb80   :  { %v1324_v30 = vmul.f32 %v1319_v29, %v2355_v4 }
 0xb81   :  { %v1384_v44 = vpop.permute.xlu0 %1383 }
 0xb82   :  { %v1326_v33 = vadd.f32 %v1325_v28, %v1324_v30 }
 0xb83   :  { %v1380_v34 = vpop.permute.xlu1 %1379 }
 0xb84   :  { %1946 = vtanh.f32 %v1326_v33  ;;  %v1385_v31 = vmul.f32 %v1380_v34, %v2359_v56 }
 0xb86   :  { %v1387_v39 = vadd.f32 %v1386_v37, %v1385_v31 }
 0xb87   :  { %v1323_v41 = vpop.permute.xlu1 %1322 }
 0xb88   :  { %1948 = vtanh.f32 %v1387_v39 }
 0xb91   :  { %v1947_v35 = vpop.eup %1946 }
 0xb92   :  { %v1328_v42 = vmul.f32 %v1947_v35, %v1323_v41 }
 0xb94   :  { %v1329_v18 = vpack.c.bf16 %v1328_v42, %v1328_v42 }
 0xb95   :  { %v1949_v1 = vpop.eup %1948 }
 0xb96   :  { %1813 = vmatmul.mubr.msk.bf16.vlgmr.msra.gmra.mxu0 %vm160_vm2, %v1329_v18  ;;  %v1389_v45 = vmul.f32 %v1949_v1, %v1384_v44 }
 0xb98   :  { %v1390_v38 = vpack.c.bf16 %v1389_v45, %v1389_v45 }
 0xb9a   :  { %1821 = vmatmul.mubr.msk.bf16.vlgmr.msra.gmra.mxu1 %vm160_vm2, %v1390_v38 }
 0xc56   :  { %v1428_v48 = vpop.f32.mrf.mxu0 }
 0xc58   :  { %v1814_v43 = vpop.f32.mrf.mxu0 }
 0xc5a   :  { %v1431_v49 = vpop.f32.mrf.mxu0  ;;  %v1471_v50 = vpop.f32.mrf.mxu1 }
 0xc5b   :  { %v1472_v51 = vadd.f32 %v1471_v50, %v1428_v48 }
 0xc5c   :  { %v1815_v52 = vpop.f32.mrf.mxu0  ;;  %v1822_v4 = vpop.f32.mrf.mxu1 }
 0xc5d   :  { %v1477_v53 = vadd.f32 %v1959_v54, %v1472_v51 }
 0xc5e   :  { %v1474_v55 = vpop.f32.mrf.mxu1 }
 0xc5f   :  { %v1544_v56 = vmul.f32 -1.442695, %v1477_v53  ;;  %1950 = vtanh.f32 %v1477_v53 }
 0xc60   :  { %v1823_v57 = vpop.f32.mrf.mxu1 }
 0xc61   :  { %1952 = vpow2.f32 %v1544_v56 }
 0xc6c   :  { %v1951_v58 = vpop.eup %1950 }
 0xc6d   :  { %1487 = vrot.lane.b32.xlu0 %v1951_v58, %s1965_s4 }
 0xc6e   :  { %v1953_v59 = vpop.eup %1952 }
 0xc6f   :  { %v1481_v60 = vadd.f32 1.0, %v1953_v59 }
 0xc71   :  { %1954 = vrcp.f32 %v1481_v60 }
 0xc7e   :  { %v1955_v2 = vpop.eup %1954 }
 0xc7f   :  { %1485 = vrot.lane.b32.xlu1 %v1955_v2, %s1964_s20 }
 0xc83   :  { %1489 = vrot.lane.b32.xlu1 %v1955_v2, %s1963_s0 }
 0xcdf   :  { %v1488_v61 = vpop.permute.xlu0 %1487 }
 0xce0   :  { %v1492_v5 = vmul.f32 %v1955_v2, %v1488_v61 }
 0xcf1   :  { %v1486_v63 = vpop.permute.xlu1 %1485 }
 0xcf2   :  { %v1491_v8 = vmul.f32 %v1486_v63, %v1326_v33 }
 0xcf4   :  { %v1493_v15 = vadd.f32 %v1492_v5, %v1491_v8 }
 0xcf5   :  { %v1490_v7 = vpop.permute.xlu1 %1489 }
 0xcf6   :  { %1956 = vtanh.f32 %v1493_v15 }
 0xd03   :  { %v1957_v40 = vpop.eup %1956 }
 0xd04   :  { %v1495_v9 = vmul.f32 %v1957_v40, %v1490_v7 }
 0xd06   :  { %1496 = vst.msk [vmem:[%s2413_s7] sm:$0xff] %vm160_vm2, %v1495_v9 }

</bundles_post_ra>
